<compile_context>
chip_gen: v7x
topology: tpu7x:2x2x1
jax: 0.10.0
libtpu: 0.0.40
codegen_flags: <defaults>
</compile_context>

<pallas_src>
import math
import numpy as np

import jax
import jax.numpy as jnp
from jax import lax
from jax.experimental import pallas as pl
from jax.experimental.pallas import tpu as pltpu  # noqa: F401  (TPU backend)

# ---------------- config (small, consistent with the module) ----------------
B = 2                # batch
LEN_IN = 8           # len_in (sequence length)
BL = B * LEN_IN      # folded row count
D_IN = 10            # d_in
D_ATT = 64           # d_att
N_HEADS = 4          # n_heads
D_HEAD = D_ATT // N_HEADS
N_ENC = 2            # n_encoder
W_EMB = 32           # WidthsEmbedding = [32]
D_FF = 4 * D_ATT     # TODO(synk): EncoderLayer FF inner width not given in source; using 4*d_att
N_CLASS = LEN_IN + 1
N_PAD = 128          # lane-dense classifier width (sliced back to N_CLASS in wrapper)
LN_EPS = 1e-5        # torch LayerNorm default eps
NEG_INF = -1e30


# ------------------------------ Pallas kernel --------------------------------
def _layernorm(v, g, b):
    mu = jnp.mean(v, axis=-1, keepdims=True)
    var = jnp.mean((v - mu) ** 2, axis=-1, keepdims=True)
    return (v - mu) * lax.rsqrt(var + LN_EPS) * g + b


def network_kernel(x_ref, pe_ref, mask_ref,
                   we1_ref, be1_ref, we2_ref, be2_ref,
                   wqkv_ref, bqkv_ref, wo_ref, bo_ref,
                   ffw1_ref, ffb1_ref, ffw2_ref, ffb2_ref,
                   lng_ref, lnb_ref,
                   wc1_ref, bc1_ref, wc2_ref, bc2_ref,
                   out_ref):
    """Single invocation: all B*L rows processed end-to-end (no grid)."""
    f32 = jnp.float32
    x = x_ref[...]                                                  # [BL, D_IN]

    # Embedding FeedForward: d_in -> 32 -> d_att (dropout = 0)
    h = jnp.maximum(
        jnp.dot(x, we1_ref[...], preferred_element_type=f32) + be1_ref[...], 0.0)
    x = jnp.dot(h, we2_ref[...], preferred_element_type=f32) + be2_ref[...]  # [BL, D_ATT]

    # Positional encoding (pre-tiled to [BL, D_ATT] on host)
    x = x + pe_ref[...]

    neg_mask = mask_ref[...]                                        # [H*BL, BL]

    for l in range(N_ENC):                       # static unroll over encoders
        # Fused Q/K/V projection: one [BL, D_ATT] x [D_ATT, 3*D_ATT] matmul.
        # (Q weights/bias are pre-scaled by 1/sqrt(d_head) at pack time.)
        qkv = jnp.dot(x, wqkv_ref[l], preferred_element_type=f32) + bqkv_ref[l]

        # Scores for all heads, stacked along sublanes -> one softmax pass.
        sc_tiles = []
        for hh in range(N_HEADS):
            s = hh * D_HEAD
            qh = qkv[:, s:s + D_HEAD]
            kh = qkv[:, D_ATT + s:D_ATT + s + D_HEAD]
            sc_tiles.append(
                lax.dot_general(qh, kh, (((1,), (1,)), ((), ())),
                                preferred_element_type=f32))        # [BL, BL]
        sc_all = jnp.concatenate(sc_tiles, axis=0) + neg_mask       # [H*BL, BL]
        sc_all = sc_all - jnp.max(sc_all, axis=-1, keepdims=True)
        p_all = jnp.exp(sc_all)
        p_all = p_all * pl.reciprocal(
            jnp.sum(p_all, axis=-1, keepdims=True), approx=True)

        # Per-head P@V; concat(heads) @ Wo decomposed as sum over per-head
        # slices of Wo (avoids lane-axis concatenation).
        wo_l = wo_ref[l]
        acc = None
        for hh in range(N_HEADS):
            s = hh * D_HEAD
            ph = p_all[hh * BL:(hh + 1) * BL, :]
            vh = qkv[:, 2 * D_ATT + s:2 * D_ATT + s + D_HEAD]
            oh = jnp.dot(ph, vh, preferred_element_type=f32)        # [BL, D_HEAD]
            contrib = jnp.dot(oh, wo_l[s:s + D_HEAD, :],
                              preferred_element_type=f32)
            acc = contrib if acc is None else acc + contrib
        attn_out = acc + bo_ref[l]

        # post-norm encoder layer
        x = _layernorm(x + attn_out, lng_ref[l, 0], lnb_ref[l, 0])

        ff = jnp.maximum(
            jnp.dot(x, ffw1_ref[l], preferred_element_type=f32) + ffb1_ref[l], 0.0)
        ff = jnp.dot(ff, ffw2_ref[l], preferred_element_type=f32) + ffb2_ref[l]
        x = _layernorm(x + ff, lng_ref[l, 1], lnb_ref[l, 1])

    # Classifier FeedForward: d_att -> 32 -> (len_in+1, lane-padded to 128).
    h = jnp.maximum(
        jnp.dot(x, wc1_ref[...], preferred_element_type=f32) + bc1_ref[...], 0.0)
    logits = jnp.dot(h, wc2_ref[...], preferred_element_type=f32) + bc2_ref[...]

    # F.softmax(x, dim=-1); padded lanes carry a -1e30 bias -> exp == 0.
    logits = logits - jnp.max(logits, axis=-1, keepdims=True)
    e = jnp.exp(logits)
    out_ref[...] = e * pl.reciprocal(jnp.sum(e, axis=-1, keepdims=True), approx=True)


# ------------------------------ wrapper ---------------------------------------
def _cost_estimate():
    flops = 2 * BL * (D_IN * W_EMB + W_EMB * D_ATT)
    flops += N_ENC * 2 * BL * (D_ATT * 3 * D_ATT + D_ATT * D_ATT + 2 * D_ATT * D_FF)
    flops += N_ENC * N_HEADS * 2 * BL * (2 * BL * D_HEAD)
    flops += 2 * BL * (D_ATT * W_EMB + W_EMB * N_PAD)
    trans = N_ENC * N_HEADS * BL * BL + BL * N_PAD + N_ENC * 2 * BL
    bytes_accessed = 4 * (
        BL * D_IN + BL * N_PAD + BL * D_ATT + N_HEADS * BL * BL
        + D_IN * W_EMB + W_EMB + W_EMB * D_ATT + D_ATT
        + N_ENC * (D_ATT * 3 * D_ATT + 3 * D_ATT + D_ATT * D_ATT + D_ATT
                   + D_ATT * D_FF + D_FF + D_FF * D_ATT + D_ATT + 4 * D_ATT)
        + D_ATT * W_EMB + W_EMB + W_EMB * N_PAD + N_PAD)
    return pl.CostEstimate(flops=flops, transcendentals=trans,
                           bytes_accessed=bytes_accessed)


def network_forward(x, params):
    (pe, we1, be1, we2, be2, qkvo_w, qkvo_b,
     ffw1, ffb1, ffw2, ffb2, lng, lnb, wc1, bc1, wc2, bc2) = params

    # --- host-side repacks (tiny; fused by XLA around the custom call) ---
    x2 = x.reshape(BL, D_IN)
    pe_t = jnp.tile(pe, (B, 1))                                    # [BL, D_ATT]

    # fold 1/sqrt(d_head) into the Q projection (exact: 0.25)
    inv_sqrt_dh = 1.0 / math.sqrt(D_HEAD)
    wqkv = jnp.concatenate([qkvo_w[:, 0] * inv_sqrt_dh,
                            qkvo_w[:, 1], qkvo_w[:, 2]], axis=-1)  # [N_ENC, D_ATT, 3*D_ATT]
    bqkv = jnp.concatenate([qkvo_b[:, 0] * inv_sqrt_dh,
                            qkvo_b[:, 1], qkvo_b[:, 2]], axis=-1)  # [N_ENC, 1, 3*D_ATT]
    wo = qkvo_w[:, 3]                                              # [N_ENC, D_ATT, D_ATT]
    bo = qkvo_b[:, 3]                                              # [N_ENC, 1, D_ATT]

    # lane-dense classifier: pad to 128 output lanes; padded cols get -1e30 bias
    wc2p = jnp.zeros((W_EMB, N_PAD), jnp.float32).at[:, :N_CLASS].set(wc2)
    bc2p = jnp.full((1, N_PAD), NEG_INF, jnp.float32).at[:, :N_CLASS].set(bc2)

    # block-diagonal additive mask (0 within batch, -1e30 across), tiled per head
    row_b = jnp.arange(BL) // LEN_IN
    mask_small = jnp.where(row_b[:, None] == row_b[None, :], 0.0, NEG_INF
                           ).astype(jnp.float32)                   # [BL, BL]
    mask_t = jnp.tile(mask_small, (N_HEADS, 1))                    # [H*BL, BL]

    out = pl.pallas_call(
        network_kernel,
        out_shape=jax.ShapeDtypeStruct((BL, N_PAD), jnp.float32),
        cost_estimate=_cost_estimate(),
    )(x2, pe_t, mask_t, we1, be1, we2, be2, wqkv, bqkv, wo, bo,
      ffw1, ffb1, ffw2, ffb2, lng, lnb, wc1, bc1, wc2p, bc2p)

    return out[:, :N_CLASS].reshape(B, LEN_IN, N_CLASS)


# ------------------------- params / reference ---------------------------------
def sinusoidal_pe(max_len, d):
    pos = np.arange(max_len, dtype=np.float64)[:, None]
    div = np.exp(np.arange(0, d, 2, dtype=np.float64) * (-math.log(10000.0) / d))
    pe = np.zeros((max_len, d), dtype=np.float64)
    pe[:, 0::2] = np.sin(pos * div)
    pe[:, 1::2] = np.cos(pos * div)
    return jnp.asarray(pe, jnp.float32)


def init_params(key):
    ks = jax.random.split(key, 12)

    def w(k, shape, fan_in):
        return jax.random.normal(k, shape, jnp.float32) / math.sqrt(fan_in)

    pe = sinusoidal_pe(LEN_IN, D_ATT)
    # Embedding MLP
    we1 = w(ks[0], (D_IN, W_EMB), D_IN)
    be1 = 0.01 * jax.random.normal(ks[1], (1, W_EMB), jnp.float32)
    we2 = w(ks[2], (W_EMB, D_ATT), W_EMB)
    be2 = 0.01 * jax.random.normal(ks[3], (1, D_ATT), jnp.float32)
    # Encoder layers (q,k,v,o projections stacked)
    qkvo_w = w(ks[4], (N_ENC, 4, D_ATT, D_ATT), D_ATT)
    qkvo_b = 0.01 * jax.random.normal(ks[5], (N_ENC, 4, 1, D_ATT), jnp.float32)
    ffw1 = w(ks[6], (N_ENC, D_ATT, D_FF), D_ATT)
    ffb1 = 0.01 * jax.random.normal(ks[7], (N_ENC, 1, D_FF), jnp.float32)
    ffw2 = w(ks[8], (N_ENC, D_FF, D_ATT), D_FF)
    ffb2 = 0.01 * jax.random.normal(ks[9], (N_ENC, 1, D_ATT), jnp.float32)
    lng = jnp.ones((N_ENC, 2, 1, D_ATT), jnp.float32)   # LayerNorm gamma
    lnb = jnp.zeros((N_ENC, 2, 1, D_ATT), jnp.float32)  # LayerNorm beta
    # Classifier MLP
    wc1 = w(ks[10], (D_ATT, W_EMB), D_ATT)
    bc1 = jnp.zeros((1, W_EMB), jnp.float32)
    wc2 = w(ks[11], (W_EMB, N_CLASS), W_EMB)
    bc2 = jnp.zeros((1, N_CLASS), jnp.float32)
    return (pe, we1, be1, we2, be2, qkvo_w, qkvo_b,
            ffw1, ffb1, ffw2, ffb2, lng, lnb, wc1, bc1, wc2, bc2)


def reference_forward(x, params):
    """Pure-JAX reference mirroring the PyTorch module (for validation)."""
    (pe, we1, be1, we2, be2, qkvo_w, qkvo_b,
     ffw1, ffb1, ffw2, ffb2, lng, lnb, wc1, bc1, wc2, bc2) = params
    P = lax.Precision.HIGHEST

    def ln(v, g, b):
        mu = jnp.mean(v, axis=-1, keepdims=True)
        var = jnp.mean((v - mu) ** 2, axis=-1, keepdims=True)
        return (v - mu) * lax.rsqrt(var + LN_EPS) * g + b

    h = jax.nn.relu(jnp.einsum('bli,io->blo', x, we1, precision=P) + be1[0])
    y = jnp.einsum('bli,io->blo', h, we2, precision=P) + be2[0]
    y = y + pe[None]
    for l in range(N_ENC):
        q = jnp.einsum('bli,io->blo', y, qkvo_w[l, 0], precision=P) + qkvo_b[l, 0, 0]
        k = jnp.einsum('bli,io->blo', y, qkvo_w[l, 1], precision=P) + qkvo_b[l, 1, 0]
        v = jnp.einsum('bli,io->blo', y, qkvo_w[l, 2], precision=P) + qkvo_b[l, 2, 0]
        qh = q.reshape(B, LEN_IN, N_HEADS, D_HEAD)
        kh = k.reshape(B, LEN_IN, N_HEADS, D_HEAD)
        vh = v.reshape(B, LEN_IN, N_HEADS, D_HEAD)
        sc = jnp.einsum('blhd,bmhd->bhlm', qh, kh, precision=P) / math.sqrt(D_HEAD)
        p = jax.nn.softmax(sc, axis=-1)
        o = jnp.einsum('bhlm,bmhd->blhd', p, vh, precision=P).reshape(B, LEN_IN, D_ATT)
        o = jnp.einsum('bli,io->blo', o, qkvo_w[l, 3], precision=P) + qkvo_b[l, 3, 0]
        y = ln(y + o, lng[l, 0, 0], lnb[l, 0, 0])
        ff = jax.nn.relu(jnp.einsum('bli,io->blo', y, ffw1[l], precision=P) + ffb1[l, 0])
        ff = jnp.einsum('bli,io->blo', ff, ffw2[l], precision=P) + ffb2[l, 0]
        y = ln(y + ff, lng[l, 1, 0], lnb[l, 1, 0])
    h = jax.nn.relu(jnp.einsum('bli,io->blo', y, wc1, precision=P) + bc1[0])
    logits = jnp.einsum('bli,io->blo', h, wc2, precision=P) + bc2[0]
    return jax.nn.softmax(logits, axis=-1)


# ------------------------------ main ------------------------------------------
if __name__ == "__main__":
    key = jax.random.PRNGKey(0)
    pkey, xkey = jax.random.split(key)
    params = init_params(pkey)
    x = jax.random.normal(xkey, (B, LEN_IN, D_IN), jnp.float32)

    out = network_forward(x, params)
    out = jax.block_until_ready(out)

    ref = reference_forward(x, params)
    np.testing.assert_allclose(np.asarray(out), np.asarray(ref), rtol=1e-2, atol=1e-2)
    assert out.shape == (B, LEN_IN, N_CLASS)
    print("KERNEL_OK")
</pallas_src>

<mosaic_0001>
module attributes {stable_mosaic.version = 11 : i64} {
  func.func @network_kernel(%arg0: memref<16x10xf32, #tpu.memory_space<vmem>>, %arg1: memref<16x64xf32, #tpu.memory_space<vmem>>, %arg2: memref<64x16xf32, #tpu.memory_space<vmem>>, %arg3: memref<10x32xf32, #tpu.memory_space<vmem>>, %arg4: memref<1x32xf32, #tpu.memory_space<vmem>>, %arg5: memref<32x64xf32, #tpu.memory_space<vmem>>, %arg6: memref<1x64xf32, #tpu.memory_space<vmem>>, %arg7: memref<2x64x192xf32, #tpu.memory_space<vmem>>, %arg8: memref<2x1x192xf32, #tpu.memory_space<vmem>>, %arg9: memref<2x64x64xf32, #tpu.memory_space<vmem>>, %arg10: memref<2x1x64xf32, #tpu.memory_space<vmem>>, %arg11: memref<2x64x256xf32, #tpu.memory_space<vmem>>, %arg12: memref<2x1x256xf32, #tpu.memory_space<vmem>>, %arg13: memref<2x256x64xf32, #tpu.memory_space<vmem>>, %arg14: memref<2x1x64xf32, #tpu.memory_space<vmem>>, %arg15: memref<2x2x1x64xf32, #tpu.memory_space<vmem>>, %arg16: memref<2x2x1x64xf32, #tpu.memory_space<vmem>>, %arg17: memref<64x32xf32, #tpu.memory_space<vmem>>, %arg18: memref<1x32xf32, #tpu.memory_space<vmem>>, %arg19: memref<32x128xf32, #tpu.memory_space<vmem>>, %arg20: memref<1x128xf32, #tpu.memory_space<vmem>>, %arg21: memref<16x128xf32, #tpu.memory_space<vmem>>) attributes {dimension_semantics = [], scalar_prefetch = 0 : i64, scratch_operands = 0 : i64, tpu.core_type = #tpu.core_type<tc>} {
    %c0 = arith.constant 0 : index
    %c0_0 = arith.constant 0 : index
    %0 = vector.load %arg0[%c0, %c0_0] : memref<16x10xf32, #tpu.memory_space<vmem>>, vector<16x10xf32>
    %c0_1 = arith.constant 0 : index
    %c0_2 = arith.constant 0 : index
    %1 = vector.load %arg3[%c0_1, %c0_2] : memref<10x32xf32, #tpu.memory_space<vmem>>, vector<10x32xf32>
    %cst = arith.constant dense<0.000000e+00> : vector<16x32xf32>
    %2 = tpu.matmul %0, %1, %cst {dimension_numbers = #tpu.dot_dimension_numbers<[1], [0], [0], [1], [0, 0, 1, 1], [], []>} : vector<16x10xf32>, vector<10x32xf32>, vector<16x32xf32> -> vector<16x32xf32>
    %c0_3 = arith.constant 0 : index
    %c0_4 = arith.constant 0 : index
    %3 = vector.load %arg4[%c0_3, %c0_4] : memref<1x32xf32, #tpu.memory_space<vmem>>, vector<1x32xf32>
    %4 = vector.broadcast %3 : vector<1x32xf32> to vector<16x32xf32>
    %5 = arith.addf %2, %4 : vector<16x32xf32>
    %cst_5 = arith.constant 0.000000e+00 : f32
    %6 = vector.broadcast %cst_5 : f32 to vector<16x32xf32>
    %7 = arith.maximumf %5, %6 : vector<16x32xf32>
    %c0_6 = arith.constant 0 : index
    %c0_7 = arith.constant 0 : index
    %8 = vector.load %arg5[%c0_6, %c0_7] : memref<32x64xf32, #tpu.memory_space<vmem>>, vector<32x64xf32>
    %cst_8 = arith.constant dense<0.000000e+00> : vector<16x64xf32>
    %9 = tpu.matmul %7, %8, %cst_8 {dimension_numbers = #tpu.dot_dimension_numbers<[1], [0], [0], [1], [0, 0, 1, 1], [], []>} : vector<16x32xf32>, vector<32x64xf32>, vector<16x64xf32> -> vector<16x64xf32>
    %c0_9 = arith.constant 0 : index
    %c0_10 = arith.constant 0 : index
    %10 = vector.load %arg6[%c0_9, %c0_10] : memref<1x64xf32, #tpu.memory_space<vmem>>, vector<1x64xf32>
    %11 = vector.broadcast %10 : vector<1x64xf32> to vector<16x64xf32>
    %12 = arith.addf %9, %11 : vector<16x64xf32>
    %c0_11 = arith.constant 0 : index
    %c0_12 = arith.constant 0 : index
    %13 = vector.load %arg1[%c0_11, %c0_12] : memref<16x64xf32, #tpu.memory_space<vmem>>, vector<16x64xf32>
    %14 = arith.addf %12, %13 : vector<16x64xf32>
    %c0_13 = arith.constant 0 : index
    %c0_14 = arith.constant 0 : index
    %15 = vector.load %arg2[%c0_13, %c0_14] : memref<64x16xf32, #tpu.memory_space<vmem>>, vector<64x16xf32>
    %c0_15 = arith.constant 0 : index
    %c0_16 = arith.constant 0 : index
    %c0_17 = arith.constant 0 : index
    %16 = vector.load %arg7[%c0_15, %c0_16, %c0_17] : memref<2x64x192xf32, #tpu.memory_space<vmem>>, vector<1x64x192xf32>
    %17 = vector.shape_cast %16 : vector<1x64x192xf32> to vector<64x192xf32>
    %cst_18 = arith.constant dense<0.000000e+00> : vector<16x192xf32>
    %18 = tpu.matmul %14, %17, %cst_18 {dimension_numbers = #tpu.dot_dimension_numbers<[1], [0], [0], [1], [0, 0, 1, 1], [], []>} : vector<16x64xf32>, vector<64x192xf32>, vector<16x192xf32> -> vector<16x192xf32>
    %c0_19 = arith.constant 0 : index
    %c0_20 = arith.constant 0 : index
    %c0_21 = arith.constant 0 : index
    %19 = vector.load %arg8[%c0_19, %c0_20, %c0_21] : memref<2x1x192xf32, #tpu.memory_space<vmem>>, vector<1x1x192xf32>
    %20 = vector.shape_cast %19 : vector<1x1x192xf32> to vector<1x192xf32>
    %21 = vector.broadcast %20 : vector<1x192xf32> to vector<16x192xf32>
    %22 = arith.addf %18, %21 : vector<16x192xf32>
    %23 = vector.extract_strided_slice %22 {offsets = [0, 0], sizes = [16, 16], strides = [1, 1]} : vector<16x192xf32> to vector<16x16xf32>
    %24 = vector.extract_strided_slice %22 {offsets = [0, 64], sizes = [16, 16], strides = [1, 1]} : vector<16x192xf32> to vector<16x16xf32>
    %cst_22 = arith.constant dense<0.000000e+00> : vector<16x16xf32>
    %25 = tpu.matmul %23, %24, %cst_22 {dimension_numbers = #tpu.dot_dimension_numbers<[1], [1], [0], [0], [0, 0, 1, 0], [], []>} : vector<16x16xf32>, vector<16x16xf32>, vector<16x16xf32> -> vector<16x16xf32>
    %26 = vector.extract_strided_slice %22 {offsets = [0, 16], sizes = [16, 16], strides = [1, 1]} : vector<16x192xf32> to vector<16x16xf32>
    %27 = vector.extract_strided_slice %22 {offsets = [0, 80], sizes = [16, 16], strides = [1, 1]} : vector<16x192xf32> to vector<16x16xf32>
    %cst_23 = arith.constant dense<0.000000e+00> : vector<16x16xf32>
    %28 = tpu.matmul %26, %27, %cst_23 {dimension_numbers = #tpu.dot_dimension_numbers<[1], [1], [0], [0], [0, 0, 1, 0], [], []>} : vector<16x16xf32>, vector<16x16xf32>, vector<16x16xf32> -> vector<16x16xf32>
    %29 = vector.extract_strided_slice %22 {offsets = [0, 32], sizes = [16, 16], strides = [1, 1]} : vector<16x192xf32> to vector<16x16xf32>
    %30 = vector.extract_strided_slice %22 {offsets = [0, 96], sizes = [16, 16], strides = [1, 1]} : vector<16x192xf32> to vector<16x16xf32>
    %cst_24 = arith.constant dense<0.000000e+00> : vector<16x16xf32>
    %31 = tpu.matmul %29, %30, %cst_24 {dimension_numbers = #tpu.dot_dimension_numbers<[1], [1], [0], [0], [0, 0, 1, 0], [], []>} : vector<16x16xf32>, vector<16x16xf32>, vector<16x16xf32> -> vector<16x16xf32>
    %32 = vector.extract_strided_slice %22 {offsets = [0, 48], sizes = [16, 16], strides = [1, 1]} : vector<16x192xf32> to vector<16x16xf32>
    %33 = vector.extract_strided_slice %22 {offsets = [0, 112], sizes = [16, 16], strides = [1, 1]} : vector<16x192xf32> to vector<16x16xf32>
    %cst_25 = arith.constant dense<0.000000e+00> : vector<16x16xf32>
    %34 = tpu.matmul %32, %33, %cst_25 {dimension_numbers = #tpu.dot_dimension_numbers<[1], [1], [0], [0], [0, 0, 1, 0], [], []>} : vector<16x16xf32>, vector<16x16xf32>, vector<16x16xf32> -> vector<16x16xf32>
    %35 = tpu.concatenate %25, %28, %31, %34 in 0 : vector<16x16xf32>, vector<16x16xf32>, vector<16x16xf32>, vector<16x16xf32> -> vector<64x16xf32>
    %36 = arith.addf %35, %15 : vector<64x16xf32>
    %cst_26 = arith.constant dense<0xFF800000> : vector<64xf32>
    %37 = vector.multi_reduction <maximumf>, %36, %cst_26 [1] : vector<64x16xf32> to vector<64xf32>
    %38 = vector.shape_cast %37 : vector<64xf32> to vector<64x1xf32>
    %39 = vector.broadcast %38 : vector<64x1xf32> to vector<64x16xf32>
    %40 = arith.subf %36, %39 : vector<64x16xf32>
    %41 = math.exp %40 : vector<64x16xf32>
    %cst_27 = arith.constant dense<0.000000e+00> : vector<64xf32>
    %42 = vector.multi_reduction <add>, %41, %cst_27 [1] : vector<64x16xf32> to vector<64xf32>
    %43 = vector.shape_cast %42 : vector<64xf32> to vector<64x1xf32>
    %44 = tpu.reciprocal %43 {approx = true} : vector<64x1xf32> -> vector<64x1xf32>
    %45 = vector.broadcast %44 : vector<64x1xf32> to vector<64x16xf32>
    %46 = arith.mulf %41, %45 : vector<64x16xf32>
    %c0_28 = arith.constant 0 : index
    %c0_29 = arith.constant 0 : index
    %c0_30 = arith.constant 0 : index
    %47 = vector.load %arg9[%c0_28, %c0_29, %c0_30] : memref<2x64x64xf32, #tpu.memory_space<vmem>>, vector<1x64x64xf32>
    %48 = vector.shape_cast %47 : vector<1x64x64xf32> to vector<64x64xf32>
    %49 = vector.extract_strided_slice %46 {offsets = [0, 0], sizes = [16, 16], strides = [1, 1]} : vector<64x16xf32> to vector<16x16xf32>
    %50 = vector.extract_strided_slice %22 {offsets = [0, 128], sizes = [16, 16], strides = [1, 1]} : vector<16x192xf32> to vector<16x16xf32>
    %cst_31 = arith.constant dense<0.000000e+00> : vector<16x16xf32>
    %51 = tpu.matmul %49, %50, %cst_31 {dimension_numbers = #tpu.dot_dimension_numbers<[1], [0], [0], [1], [0, 0, 1, 1], [], []>} : vector<16x16xf32>, vector<16x16xf32>, vector<16x16xf32> -> vector<16x16xf32>
    %52 = vector.extract_strided_slice %48 {offsets = [0, 0], sizes = [16, 64], strides = [1, 1]} : vector<64x64xf32> to vector<16x64xf32>
    %cst_32 = arith.constant dense<0.000000e+00> : vector<16x64xf32>
    %53 = tpu.matmul %51, %52, %cst_32 {dimension_numbers = #tpu.dot_dimension_numbers<[1], [0], [0], [1], [0, 0, 1, 1], [], []>} : vector<16x16xf32>, vector<16x64xf32>, vector<16x64xf32> -> vector<16x64xf32>
    %54 = vector.extract_strided_slice %46 {offsets = [16, 0], sizes = [16, 16], strides = [1, 1]} : vector<64x16xf32> to vector<16x16xf32>
    %55 = vector.extract_strided_slice %22 {offsets = [0, 144], sizes = [16, 16], strides = [1, 1]} : vector<16x192xf32> to vector<16x16xf32>
    %cst_33 = arith.constant dense<0.000000e+00> : vector<16x16xf32>
    %56 = tpu.matmul %54, %55, %cst_33 {dimension_numbers = #tpu.dot_dimension_numbers<[1], [0], [0], [1], [0, 0, 1, 1], [], []>} : vector<16x16xf32>, vector<16x16xf32>, vector<16x16xf32> -> vector<16x16xf32>
    %57 = vector.extract_strided_slice %48 {offsets = [16, 0], sizes = [16, 64], strides = [1, 1]} : vector<64x64xf32> to vector<16x64xf32>
    %cst_34 = arith.constant dense<0.000000e+00> : vector<16x64xf32>
    %58 = tpu.matmul %56, %57, %cst_34 {dimension_numbers = #tpu.dot_dimension_numbers<[1], [0], [0], [1], [0, 0, 1, 1], [], []>} : vector<16x16xf32>, vector<16x64xf32>, vector<16x64xf32> -> vector<16x64xf32>
    %59 = arith.addf %53, %58 : vector<16x64xf32>
    %60 = vector.extract_strided_slice %46 {offsets = [32, 0], sizes = [16, 16], strides = [1, 1]} : vector<64x16xf32> to vector<16x16xf32>
    %61 = vector.extract_strided_slice %22 {offsets = [0, 160], sizes = [16, 16], strides = [1, 1]} : vector<16x192xf32> to vector<16x16xf32>
    %cst_35 = arith.constant dense<0.000000e+00> : vector<16x16xf32>
    %62 = tpu.matmul %60, %61, %cst_35 {dimension_numbers = #tpu.dot_dimension_numbers<[1], [0], [0], [1], [0, 0, 1, 1], [], []>} : vector<16x16xf32>, vector<16x16xf32>, vector<16x16xf32> -> vector<16x16xf32>
    %63 = vector.extract_strided_slice %48 {offsets = [32, 0], sizes = [16, 64], strides = [1, 1]} : vector<64x64xf32> to vector<16x64xf32>
    %cst_36 = arith.constant dense<0.000000e+00> : vector<16x64xf32>
    %64 = tpu.matmul %62, %63, %cst_36 {dimension_numbers = #tpu.dot_dimension_numbers<[1], [0], [0], [1], [0, 0, 1, 1], [], []>} : vector<16x16xf32>, vector<16x64xf32>, vector<16x64xf32> -> vector<16x64xf32>
    %65 = arith.addf %59, %64 : vector<16x64xf32>
    %66 = vector.extract_strided_slice %46 {offsets = [48, 0], sizes = [16, 16], strides = [1, 1]} : vector<64x16xf32> to vector<16x16xf32>
    %67 = vector.extract_strided_slice %22 {offsets = [0, 176], sizes = [16, 16], strides = [1, 1]} : vector<16x192xf32> to vector<16x16xf32>
    %cst_37 = arith.constant dense<0.000000e+00> : vector<16x16xf32>
    %68 = tpu.matmul %66, %67, %cst_37 {dimension_numbers = #tpu.dot_dimension_numbers<[1], [0], [0], [1], [0, 0, 1, 1], [], []>} : vector<16x16xf32>, vector<16x16xf32>, vector<16x16xf32> -> vector<16x16xf32>
    %69 = vector.extract_strided_slice %48 {offsets = [48, 0], sizes = [16, 64], strides = [1, 1]} : vector<64x64xf32> to vector<16x64xf32>
    %cst_38 = arith.constant dense<0.000000e+00> : vector<16x64xf32>
    %70 = tpu.matmul %68, %69, %cst_38 {dimension_numbers = #tpu.dot_dimension_numbers<[1], [0], [0], [1], [0, 0, 1, 1], [], []>} : vector<16x16xf32>, vector<16x64xf32>, vector<16x64xf32> -> vector<16x64xf32>
    %71 = arith.addf %65, %70 : vector<16x64xf32>
    %c0_39 = arith.constant 0 : index
    %c0_40 = arith.constant 0 : index
    %c0_41 = arith.constant 0 : index
    %72 = vector.load %arg10[%c0_39, %c0_40, %c0_41] : memref<2x1x64xf32, #tpu.memory_space<vmem>>, vector<1x1x64xf32>
    %73 = vector.shape_cast %72 : vector<1x1x64xf32> to vector<1x64xf32>
    %74 = vector.broadcast %73 : vector<1x64xf32> to vector<16x64xf32>
    %75 = arith.addf %71, %74 : vector<16x64xf32>
    %76 = arith.addf %14, %75 : vector<16x64xf32>
    %c0_42 = arith.constant 0 : index
    %c0_43 = arith.constant 0 : index
    %c0_44 = arith.constant 0 : index
    %c0_45 = arith.constant 0 : index
    %77 = vector.load %arg15[%c0_42, %c0_43, %c0_44, %c0_45] : memref<2x2x1x64xf32, #tpu.memory_space<vmem>>, vector<1x1x1x64xf32>
    %78 = vector.shape_cast %77 : vector<1x1x1x64xf32> to vector<1x64xf32>
    %c0_46 = arith.constant 0 : index
    %c0_47 = arith.constant 0 : index
    %c0_48 = arith.constant 0 : index
    %c0_49 = arith.constant 0 : index
    %79 = vector.load %arg16[%c0_46, %c0_47, %c0_48, %c0_49] : memref<2x2x1x64xf32, #tpu.memory_space<vmem>>, vector<1x1x1x64xf32>
    %80 = vector.shape_cast %79 : vector<1x1x1x64xf32> to vector<1x64xf32>
    %cst_50 = arith.constant dense<0.000000e+00> : vector<16xf32>
    %81 = vector.multi_reduction <add>, %76, %cst_50 [1] : vector<16x64xf32> to vector<16xf32>
    %82 = vector.shape_cast %81 : vector<16xf32> to vector<16x1xf32>
    %cst_51 = arith.constant 6.400000e+01 : f32
    %83 = vector.broadcast %cst_51 : f32 to vector<16x1xf32>
    %84 = arith.divf %82, %83 : vector<16x1xf32>
    %85 = vector.broadcast %84 : vector<16x1xf32> to vector<16x64xf32>
    %86 = arith.subf %76, %85 : vector<16x64xf32>
    %87 = arith.mulf %86, %86 : vector<16x64xf32>
    %cst_52 = arith.constant dense<0.000000e+00> : vector<16xf32>
    %88 = vector.multi_reduction <add>, %87, %cst_52 [1] : vector<16x64xf32> to vector<16xf32>
    %89 = vector.shape_cast %88 : vector<16xf32> to vector<16x1xf32>
    %cst_53 = arith.constant 6.400000e+01 : f32
    %90 = vector.broadcast %cst_53 : f32 to vector<16x1xf32>
    %91 = arith.divf %89, %90 : vector<16x1xf32>
    %92 = vector.broadcast %84 : vector<16x1xf32> to vector<16x64xf32>
    %93 = arith.subf %76, %92 : vector<16x64xf32>
    %cst_54 = arith.constant 9.99999974E-6 : f32
    %94 = vector.broadcast %cst_54 : f32 to vector<16x1xf32>
    %95 = arith.addf %91, %94 : vector<16x1xf32>
    %96 = math.rsqrt %95 : vector<16x1xf32>
    %97 = vector.broadcast %96 : vector<16x1xf32> to vector<16x64xf32>
    %98 = arith.mulf %93, %97 : vector<16x64xf32>
    %99 = vector.broadcast %78 : vector<1x64xf32> to vector<16x64xf32>
    %100 = arith.mulf %98, %99 : vector<16x64xf32>
    %101 = vector.broadcast %80 : vector<1x64xf32> to vector<16x64xf32>
    %102 = arith.addf %100, %101 : vector<16x64xf32>
    %c0_55 = arith.constant 0 : index
    %c0_56 = arith.constant 0 : index
    %c0_57 = arith.constant 0 : index
    %103 = vector.load %arg11[%c0_55, %c0_56, %c0_57] : memref<2x64x256xf32, #tpu.memory_space<vmem>>, vector<1x64x256xf32>
    %104 = vector.shape_cast %103 : vector<1x64x256xf32> to vector<64x256xf32>
    %cst_58 = arith.constant dense<0.000000e+00> : vector<16x256xf32>
    %105 = tpu.matmul %102, %104, %cst_58 {dimension_numbers = #tpu.dot_dimension_numbers<[1], [0], [0], [1], [0, 0, 1, 1], [], []>} : vector<16x64xf32>, vector<64x256xf32>, vector<16x256xf32> -> vector<16x256xf32>
    %c0_59 = arith.constant 0 : index
    %c0_60 = arith.constant 0 : index
    %c0_61 = arith.constant 0 : index
    %106 = vector.load %arg12[%c0_59, %c0_60, %c0_61] : memref<2x1x256xf32, #tpu.memory_space<vmem>>, vector<1x1x256xf32>
    %107 = vector.shape_cast %106 : vector<1x1x256xf32> to vector<1x256xf32>
    %108 = vector.broadcast %107 : vector<1x256xf32> to vector<16x256xf32>
    %109 = arith.addf %105, %108 : vector<16x256xf32>
    %cst_62 = arith.constant 0.000000e+00 : f32
    %110 = vector.broadcast %cst_62 : f32 to vector<16x256xf32>
    %111 = arith.maximumf %109, %110 : vector<16x256xf32>
    %c0_63 = arith.constant 0 : index
    %c0_64 = arith.constant 0 : index
    %c0_65 = arith.constant 0 : index
    %112 = vector.load %arg13[%c0_63, %c0_64, %c0_65] : memref<2x256x64xf32, #tpu.memory_space<vmem>>, vector<1x256x64xf32>
    %113 = vector.shape_cast %112 : vector<1x256x64xf32> to vector<256x64xf32>
    %cst_66 = arith.constant dense<0.000000e+00> : vector<16x64xf32>
    %114 = tpu.matmul %111, %113, %cst_66 {dimension_numbers = #tpu.dot_dimension_numbers<[1], [0], [0], [1], [0, 0, 1, 1], [], []>} : vector<16x256xf32>, vector<256x64xf32>, vector<16x64xf32> -> vector<16x64xf32>
    %c0_67 = arith.constant 0 : index
    %c0_68 = arith.constant 0 : index
    %c0_69 = arith.constant 0 : index
    %115 = vector.load %arg14[%c0_67, %c0_68, %c0_69] : memref<2x1x64xf32, #tpu.memory_space<vmem>>, vector<1x1x64xf32>
    %116 = vector.shape_cast %115 : vector<1x1x64xf32> to vector<1x64xf32>
    %117 = vector.broadcast %116 : vector<1x64xf32> to vector<16x64xf32>
    %118 = arith.addf %114, %117 : vector<16x64xf32>
    %119 = arith.addf %102, %118 : vector<16x64xf32>
    %c0_70 = arith.constant 0 : index
    %c1 = arith.constant 1 : index
    %c0_71 = arith.constant 0 : index
    %c0_72 = arith.constant 0 : index
    %120 = vector.load %arg15[%c0_70, %c1, %c0_71, %c0_72] : memref<2x2x1x64xf32, #tpu.memory_space<vmem>>, vector<1x1x1x64xf32>
    %121 = vector.shape_cast %120 : vector<1x1x1x64xf32> to vector<1x64xf32>
    %c0_73 = arith.constant 0 : index
    %c1_74 = arith.constant 1 : index
    %c0_75 = arith.constant 0 : index
    %c0_76 = arith.constant 0 : index
    %122 = vector.load %arg16[%c0_73, %c1_74, %c0_75, %c0_76] : memref<2x2x1x64xf32, #tpu.memory_space<vmem>>, vector<1x1x1x64xf32>
    %123 = vector.shape_cast %122 : vector<1x1x1x64xf32> to vector<1x64xf32>
    %cst_77 = arith.constant dense<0.000000e+00> : vector<16xf32>
    %124 = vector.multi_reduction <add>, %119, %cst_77 [1] : vector<16x64xf32> to vector<16xf32>
    %125 = vector.shape_cast %124 : vector<16xf32> to vector<16x1xf32>
    %cst_78 = arith.constant 6.400000e+01 : f32
    %126 = vector.broadcast %cst_78 : f32 to vector<16x1xf32>
    %127 = arith.divf %125, %126 : vector<16x1xf32>
    %128 = vector.broadcast %127 : vector<16x1xf32> to vector<16x64xf32>
    %129 = arith.subf %119, %128 : vector<16x64xf32>
    %130 = arith.mulf %129, %129 : vector<16x64xf32>
    %cst_79 = arith.constant dense<0.000000e+00> : vector<16xf32>
    %131 = vector.multi_reduction <add>, %130, %cst_79 [1] : vector<16x64xf32> to vector<16xf32>
    %132 = vector.shape_cast %131 : vector<16xf32> to vector<16x1xf32>
    %cst_80 = arith.constant 6.400000e+01 : f32
    %133 = vector.broadcast %cst_80 : f32 to vector<16x1xf32>
    %134 = arith.divf %132, %133 : vector<16x1xf32>
    %135 = vector.broadcast %127 : vector<16x1xf32> to vector<16x64xf32>
    %136 = arith.subf %119, %135 : vector<16x64xf32>
    %cst_81 = arith.constant 9.99999974E-6 : f32
    %137 = vector.broadcast %cst_81 : f32 to vector<16x1xf32>
    %138 = arith.addf %134, %137 : vector<16x1xf32>
    %139 = math.rsqrt %138 : vector<16x1xf32>
    %140 = vector.broadcast %139 : vector<16x1xf32> to vector<16x64xf32>
    %141 = arith.mulf %136, %140 : vector<16x64xf32>
    %142 = vector.broadcast %121 : vector<1x64xf32> to vector<16x64xf32>
    %143 = arith.mulf %141, %142 : vector<16x64xf32>
    %144 = vector.broadcast %123 : vector<1x64xf32> to vector<16x64xf32>
    %145 = arith.addf %143, %144 : vector<16x64xf32>
    %c1_82 = arith.constant 1 : index
    %c0_83 = arith.constant 0 : index
    %c0_84 = arith.constant 0 : index
    %146 = vector.load %arg7[%c1_82, %c0_83, %c0_84] : memref<2x64x192xf32, #tpu.memory_space<vmem>>, vector<1x64x192xf32>
    %147 = vector.shape_cast %146 : vector<1x64x192xf32> to vector<64x192xf32>
    %cst_85 = arith.constant dense<0.000000e+00> : vector<16x192xf32>
    %148 = tpu.matmul %145, %147, %cst_85 {dimension_numbers = #tpu.dot_dimension_numbers<[1], [0], [0], [1], [0, 0, 1, 1], [], []>} : vector<16x64xf32>, vector<64x192xf32>, vector<16x192xf32> -> vector<16x192xf32>
    %c1_86 = arith.constant 1 : index
    %c0_87 = arith.constant 0 : index
    %c0_88 = arith.constant 0 : index
    %149 = vector.load %arg8[%c1_86, %c0_87, %c0_88] : memref<2x1x192xf32, #tpu.memory_space<vmem>>, vector<1x1x192xf32>
    %150 = vector.shape_cast %149 : vector<1x1x192xf32> to vector<1x192xf32>
    %151 = vector.broadcast %150 : vector<1x192xf32> to vector<16x192xf32>
    %152 = arith.addf %148, %151 : vector<16x192xf32>
    %153 = vector.extract_strided_slice %152 {offsets = [0, 0], sizes = [16, 16], strides = [1, 1]} : vector<16x192xf32> to vector<16x16xf32>
    %154 = vector.extract_strided_slice %152 {offsets = [0, 64], sizes = [16, 16], strides = [1, 1]} : vector<16x192xf32> to vector<16x16xf32>
    %cst_89 = arith.constant dense<0.000000e+00> : vector<16x16xf32>
    %155 = tpu.matmul %153, %154, %cst_89 {dimension_numbers = #tpu.dot_dimension_numbers<[1], [1], [0], [0], [0, 0, 1, 0], [], []>} : vector<16x16xf32>, vector<16x16xf32>, vector<16x16xf32> -> vector<16x16xf32>
    %156 = vector.extract_strided_slice %152 {offsets = [0, 16], sizes = [16, 16], strides = [1, 1]} : vector<16x192xf32> to vector<16x16xf32>
    %157 = vector.extract_strided_slice %152 {offsets = [0, 80], sizes = [16, 16], strides = [1, 1]} : vector<16x192xf32> to vector<16x16xf32>
    %cst_90 = arith.constant dense<0.000000e+00> : vector<16x16xf32>
    %158 = tpu.matmul %156, %157, %cst_90 {dimension_numbers = #tpu.dot_dimension_numbers<[1], [1], [0], [0], [0, 0, 1, 0], [], []>} : vector<16x16xf32>, vector<16x16xf32>, vector<16x16xf32> -> vector<16x16xf32>
    %159 = vector.extract_strided_slice %152 {offsets = [0, 32], sizes = [16, 16], strides = [1, 1]} : vector<16x192xf32> to vector<16x16xf32>
    %160 = vector.extract_strided_slice %152 {offsets = [0, 96], sizes = [16, 16], strides = [1, 1]} : vector<16x192xf32> to vector<16x16xf32>
    %cst_91 = arith.constant dense<0.000000e+00> : vector<16x16xf32>
    %161 = tpu.matmul %159, %160, %cst_91 {dimension_numbers = #tpu.dot_dimension_numbers<[1], [1], [0], [0], [0, 0, 1, 0], [], []>} : vector<16x16xf32>, vector<16x16xf32>, vector<16x16xf32> -> vector<16x16xf32>
    %162 = vector.extract_strided_slice %152 {offsets = [0, 48], sizes = [16, 16], strides = [1, 1]} : vector<16x192xf32> to vector<16x16xf32>
    %163 = vector.extract_strided_slice %152 {offsets = [0, 112], sizes = [16, 16], strides = [1, 1]} : vector<16x192xf32> to vector<16x16xf32>
    %cst_92 = arith.constant dense<0.000000e+00> : vector<16x16xf32>
    %164 = tpu.matmul %162, %163, %cst_92 {dimension_numbers = #tpu.dot_dimension_numbers<[1], [1], [0], [0], [0, 0, 1, 0], [], []>} : vector<16x16xf32>, vector<16x16xf32>, vector<16x16xf32> -> vector<16x16xf32>
    %165 = tpu.concatenate %155, %158, %161, %164 in 0 : vector<16x16xf32>, vector<16x16xf32>, vector<16x16xf32>, vector<16x16xf32> -> vector<64x16xf32>
    %166 = arith.addf %165, %15 : vector<64x16xf32>
    %cst_93 = arith.constant dense<0xFF800000> : vector<64xf32>
    %167 = vector.multi_reduction <maximumf>, %166, %cst_93 [1] : vector<64x16xf32> to vector<64xf32>
    %168 = vector.shape_cast %167 : vector<64xf32> to vector<64x1xf32>
    %169 = vector.broadcast %168 : vector<64x1xf32> to vector<64x16xf32>
    %170 = arith.subf %166, %169 : vector<64x16xf32>
    %171 = math.exp %170 : vector<64x16xf32>
    %cst_94 = arith.constant dense<0.000000e+00> : vector<64xf32>
    %172 = vector.multi_reduction <add>, %171, %cst_94 [1] : vector<64x16xf32> to vector<64xf32>
    %173 = vector.shape_cast %172 : vector<64xf32> to vector<64x1xf32>
    %174 = tpu.reciprocal %173 {approx = true} : vector<64x1xf32> -> vector<64x1xf32>
    %175 = vector.broadcast %174 : vector<64x1xf32> to vector<64x16xf32>
    %176 = arith.mulf %171, %175 : vector<64x16xf32>
    %c1_95 = arith.constant 1 : index
    %c0_96 = arith.constant 0 : index
    %c0_97 = arith.constant 0 : index
    %177 = vector.load %arg9[%c1_95, %c0_96, %c0_97] : memref<2x64x64xf32, #tpu.memory_space<vmem>>, vector<1x64x64xf32>
    %178 = vector.shape_cast %177 : vector<1x64x64xf32> to vector<64x64xf32>
    %179 = vector.extract_strided_slice %176 {offsets = [0, 0], sizes = [16, 16], strides = [1, 1]} : vector<64x16xf32> to vector<16x16xf32>
    %180 = vector.extract_strided_slice %152 {offsets = [0, 128], sizes = [16, 16], strides = [1, 1]} : vector<16x192xf32> to vector<16x16xf32>
    %cst_98 = arith.constant dense<0.000000e+00> : vector<16x16xf32>
    %181 = tpu.matmul %179, %180, %cst_98 {dimension_numbers = #tpu.dot_dimension_numbers<[1], [0], [0], [1], [0, 0, 1, 1], [], []>} : vector<16x16xf32>, vector<16x16xf32>, vector<16x16xf32> -> vector<16x16xf32>
    %182 = vector.extract_strided_slice %178 {offsets = [0, 0], sizes = [16, 64], strides = [1, 1]} : vector<64x64xf32> to vector<16x64xf32>
    %cst_99 = arith.constant dense<0.000000e+00> : vector<16x64xf32>
    %183 = tpu.matmul %181, %182, %cst_99 {dimension_numbers = #tpu.dot_dimension_numbers<[1], [0], [0], [1], [0, 0, 1, 1], [], []>} : vector<16x16xf32>, vector<16x64xf32>, vector<16x64xf32> -> vector<16x64xf32>
    %184 = vector.extract_strided_slice %176 {offsets = [16, 0], sizes = [16, 16], strides = [1, 1]} : vector<64x16xf32> to vector<16x16xf32>
    %185 = vector.extract_strided_slice %152 {offsets = [0, 144], sizes = [16, 16], strides = [1, 1]} : vector<16x192xf32> to vector<16x16xf32>
    %cst_100 = arith.constant dense<0.000000e+00> : vector<16x16xf32>
    %186 = tpu.matmul %184, %185, %cst_100 {dimension_numbers = #tpu.dot_dimension_numbers<[1], [0], [0], [1], [0, 0, 1, 1], [], []>} : vector<16x16xf32>, vector<16x16xf32>, vector<16x16xf32> -> vector<16x16xf32>
    %187 = vector.extract_strided_slice %178 {offsets = [16, 0], sizes = [16, 64], strides = [1, 1]} : vector<64x64xf32> to vector<16x64xf32>
    %cst_101 = arith.constant dense<0.000000e+00> : vector<16x64xf32>
    %188 = tpu.matmul %186, %187, %cst_101 {dimension_numbers = #tpu.dot_dimension_numbers<[1], [0], [0], [1], [0, 0, 1, 1], [], []>} : vector<16x16xf32>, vector<16x64xf32>, vector<16x64xf32> -> vector<16x64xf32>
    %189 = arith.addf %183, %188 : vector<16x64xf32>
    %190 = vector.extract_strided_slice %176 {offsets = [32, 0], sizes = [16, 16], strides = [1, 1]} : vector<64x16xf32> to vector<16x16xf32>
    %191 = vector.extract_strided_slice %152 {offsets = [0, 160], sizes = [16, 16], strides = [1, 1]} : vector<16x192xf32> to vector<16x16xf32>
    %cst_102 = arith.constant dense<0.000000e+00> : vector<16x16xf32>
    %192 = tpu.matmul %190, %191, %cst_102 {dimension_numbers = #tpu.dot_dimension_numbers<[1], [0], [0], [1], [0, 0, 1, 1], [], []>} : vector<16x16xf32>, vector<16x16xf32>, vector<16x16xf32> -> vector<16x16xf32>
    %193 = vector.extract_strided_slice %178 {offsets = [32, 0], sizes = [16, 64], strides = [1, 1]} : vector<64x64xf32> to vector<16x64xf32>
    %cst_103 = arith.constant dense<0.000000e+00> : vector<16x64xf32>
    %194 = tpu.matmul %192, %193, %cst_103 {dimension_numbers = #tpu.dot_dimension_numbers<[1], [0], [0], [1], [0, 0, 1, 1], [], []>} : vector<16x16xf32>, vector<16x64xf32>, vector<16x64xf32> -> vector<16x64xf32>
    %195 = arith.addf %189, %194 : vector<16x64xf32>
    %196 = vector.extract_strided_slice %176 {offsets = [48, 0], sizes = [16, 16], strides = [1, 1]} : vector<64x16xf32> to vector<16x16xf32>
    %197 = vector.extract_strided_slice %152 {offsets = [0, 176], sizes = [16, 16], strides = [1, 1]} : vector<16x192xf32> to vector<16x16xf32>
    %cst_104 = arith.constant dense<0.000000e+00> : vector<16x16xf32>
    %198 = tpu.matmul %196, %197, %cst_104 {dimension_numbers = #tpu.dot_dimension_numbers<[1], [0], [0], [1], [0, 0, 1, 1], [], []>} : vector<16x16xf32>, vector<16x16xf32>, vector<16x16xf32> -> vector<16x16xf32>
    %199 = vector.extract_strided_slice %178 {offsets = [48, 0], sizes = [16, 64], strides = [1, 1]} : vector<64x64xf32> to vector<16x64xf32>
    %cst_105 = arith.constant dense<0.000000e+00> : vector<16x64xf32>
    %200 = tpu.matmul %198, %199, %cst_105 {dimension_numbers = #tpu.dot_dimension_numbers<[1], [0], [0], [1], [0, 0, 1, 1], [], []>} : vector<16x16xf32>, vector<16x64xf32>, vector<16x64xf32> -> vector<16x64xf32>
    %201 = arith.addf %195, %200 : vector<16x64xf32>
    %c1_106 = arith.constant 1 : index
    %c0_107 = arith.constant 0 : index
    %c0_108 = arith.constant 0 : index
    %202 = vector.load %arg10[%c1_106, %c0_107, %c0_108] : memref<2x1x64xf32, #tpu.memory_space<vmem>>, vector<1x1x64xf32>
    %203 = vector.shape_cast %202 : vector<1x1x64xf32> to vector<1x64xf32>
    %204 = vector.broadcast %203 : vector<1x64xf32> to vector<16x64xf32>
    %205 = arith.addf %201, %204 : vector<16x64xf32>
    %206 = arith.addf %145, %205 : vector<16x64xf32>
    %c1_109 = arith.constant 1 : index
    %c0_110 = arith.constant 0 : index
    %c0_111 = arith.constant 0 : index
    %c0_112 = arith.constant 0 : index
    %207 = vector.load %arg15[%c1_109, %c0_110, %c0_111, %c0_112] : memref<2x2x1x64xf32, #tpu.memory_space<vmem>>, vector<1x1x1x64xf32>
    %208 = vector.shape_cast %207 : vector<1x1x1x64xf32> to vector<1x64xf32>
    %c1_113 = arith.constant 1 : index
    %c0_114 = arith.constant 0 : index
    %c0_115 = arith.constant 0 : index
    %c0_116 = arith.constant 0 : index
    %209 = vector.load %arg16[%c1_113, %c0_114, %c0_115, %c0_116] : memref<2x2x1x64xf32, #tpu.memory_space<vmem>>, vector<1x1x1x64xf32>
    %210 = vector.shape_cast %209 : vector<1x1x1x64xf32> to vector<1x64xf32>
    %cst_117 = arith.constant dense<0.000000e+00> : vector<16xf32>
    %211 = vector.multi_reduction <add>, %206, %cst_117 [1] : vector<16x64xf32> to vector<16xf32>
    %212 = vector.shape_cast %211 : vector<16xf32> to vector<16x1xf32>
    %cst_118 = arith.constant 6.400000e+01 : f32
    %213 = vector.broadcast %cst_118 : f32 to vector<16x1xf32>
    %214 = arith.divf %212, %213 : vector<16x1xf32>
    %215 = vector.broadcast %214 : vector<16x1xf32> to vector<16x64xf32>
    %216 = arith.subf %206, %215 : vector<16x64xf32>
    %217 = arith.mulf %216, %216 : vector<16x64xf32>
    %cst_119 = arith.constant dense<0.000000e+00> : vector<16xf32>
    %218 = vector.multi_reduction <add>, %217, %cst_119 [1] : vector<16x64xf32> to vector<16xf32>
    %219 = vector.shape_cast %218 : vector<16xf32> to vector<16x1xf32>
    %cst_120 = arith.constant 6.400000e+01 : f32
    %220 = vector.broadcast %cst_120 : f32 to vector<16x1xf32>
    %221 = arith.divf %219, %220 : vector<16x1xf32>
    %222 = vector.broadcast %214 : vector<16x1xf32> to vector<16x64xf32>
    %223 = arith.subf %206, %222 : vector<16x64xf32>
    %cst_121 = arith.constant 9.99999974E-6 : f32
    %224 = vector.broadcast %cst_121 : f32 to vector<16x1xf32>
    %225 = arith.addf %221, %224 : vector<16x1xf32>
    %226 = math.rsqrt %225 : vector<16x1xf32>
    %227 = vector.broadcast %226 : vector<16x1xf32> to vector<16x64xf32>
    %228 = arith.mulf %223, %227 : vector<16x64xf32>
    %229 = vector.broadcast %208 : vector<1x64xf32> to vector<16x64xf32>
    %230 = arith.mulf %228, %229 : vector<16x64xf32>
    %231 = vector.broadcast %210 : vector<1x64xf32> to vector<16x64xf32>
    %232 = arith.addf %230, %231 : vector<16x64xf32>
    %c1_122 = arith.constant 1 : index
    %c0_123 = arith.constant 0 : index
    %c0_124 = arith.constant 0 : index
    %233 = vector.load %arg11[%c1_122, %c0_123, %c0_124] : memref<2x64x256xf32, #tpu.memory_space<vmem>>, vector<1x64x256xf32>
    %234 = vector.shape_cast %233 : vector<1x64x256xf32> to vector<64x256xf32>
    %cst_125 = arith.constant dense<0.000000e+00> : vector<16x256xf32>
    %235 = tpu.matmul %232, %234, %cst_125 {dimension_numbers = #tpu.dot_dimension_numbers<[1], [0], [0], [1], [0, 0, 1, 1], [], []>} : vector<16x64xf32>, vector<64x256xf32>, vector<16x256xf32> -> vector<16x256xf32>
    %c1_126 = arith.constant 1 : index
    %c0_127 = arith.constant 0 : index
    %c0_128 = arith.constant 0 : index
    %236 = vector.load %arg12[%c1_126, %c0_127, %c0_128] : memref<2x1x256xf32, #tpu.memory_space<vmem>>, vector<1x1x256xf32>
    %237 = vector.shape_cast %236 : vector<1x1x256xf32> to vector<1x256xf32>
    %238 = vector.broadcast %237 : vector<1x256xf32> to vector<16x256xf32>
    %239 = arith.addf %235, %238 : vector<16x256xf32>
    %cst_129 = arith.constant 0.000000e+00 : f32
    %240 = vector.broadcast %cst_129 : f32 to vector<16x256xf32>
    %241 = arith.maximumf %239, %240 : vector<16x256xf32>
    %c1_130 = arith.constant 1 : index
    %c0_131 = arith.constant 0 : index
    %c0_132 = arith.constant 0 : index
    %242 = vector.load %arg13[%c1_130, %c0_131, %c0_132] : memref<2x256x64xf32, #tpu.memory_space<vmem>>, vector<1x256x64xf32>
    %243 = vector.shape_cast %242 : vector<1x256x64xf32> to vector<256x64xf32>
    %cst_133 = arith.constant dense<0.000000e+00> : vector<16x64xf32>
    %244 = tpu.matmul %241, %243, %cst_133 {dimension_numbers = #tpu.dot_dimension_numbers<[1], [0], [0], [1], [0, 0, 1, 1], [], []>} : vector<16x256xf32>, vector<256x64xf32>, vector<16x64xf32> -> vector<16x64xf32>
    %c1_134 = arith.constant 1 : index
    %c0_135 = arith.constant 0 : index
    %c0_136 = arith.constant 0 : index
    %245 = vector.load %arg14[%c1_134, %c0_135, %c0_136] : memref<2x1x64xf32, #tpu.memory_space<vmem>>, vector<1x1x64xf32>
    %246 = vector.shape_cast %245 : vector<1x1x64xf32> to vector<1x64xf32>
    %247 = vector.broadcast %246 : vector<1x64xf32> to vector<16x64xf32>
    %248 = arith.addf %244, %247 : vector<16x64xf32>
    %249 = arith.addf %232, %248 : vector<16x64xf32>
    %c1_137 = arith.constant 1 : index
    %c1_138 = arith.constant 1 : index
    %c0_139 = arith.constant 0 : index
    %c0_140 = arith.constant 0 : index
    %250 = vector.load %arg15[%c1_137, %c1_138, %c0_139, %c0_140] : memref<2x2x1x64xf32, #tpu.memory_space<vmem>>, vector<1x1x1x64xf32>
    %251 = vector.shape_cast %250 : vector<1x1x1x64xf32> to vector<1x64xf32>
    %c1_141 = arith.constant 1 : index
    %c1_142 = arith.constant 1 : index
    %c0_143 = arith.constant 0 : index
    %c0_144 = arith.constant 0 : index
    %252 = vector.load %arg16[%c1_141, %c1_142, %c0_143, %c0_144] : memref<2x2x1x64xf32, #tpu.memory_space<vmem>>, vector<1x1x1x64xf32>
    %253 = vector.shape_cast %252 : vector<1x1x1x64xf32> to vector<1x64xf32>
    %cst_145 = arith.constant dense<0.000000e+00> : vector<16xf32>
    %254 = vector.multi_reduction <add>, %249, %cst_145 [1] : vector<16x64xf32> to vector<16xf32>
    %255 = vector.shape_cast %254 : vector<16xf32> to vector<16x1xf32>
    %cst_146 = arith.constant 6.400000e+01 : f32
    %256 = vector.broadcast %cst_146 : f32 to vector<16x1xf32>
    %257 = arith.divf %255, %256 : vector<16x1xf32>
    %258 = vector.broadcast %257 : vector<16x1xf32> to vector<16x64xf32>
    %259 = arith.subf %249, %258 : vector<16x64xf32>
    %260 = arith.mulf %259, %259 : vector<16x64xf32>
    %cst_147 = arith.constant dense<0.000000e+00> : vector<16xf32>
    %261 = vector.multi_reduction <add>, %260, %cst_147 [1] : vector<16x64xf32> to vector<16xf32>
    %262 = vector.shape_cast %261 : vector<16xf32> to vector<16x1xf32>
    %cst_148 = arith.constant 6.400000e+01 : f32
    %263 = vector.broadcast %cst_148 : f32 to vector<16x1xf32>
    %264 = arith.divf %262, %263 : vector<16x1xf32>
    %265 = vector.broadcast %257 : vector<16x1xf32> to vector<16x64xf32>
    %266 = arith.subf %249, %265 : vector<16x64xf32>
    %cst_149 = arith.constant 9.99999974E-6 : f32
    %267 = vector.broadcast %cst_149 : f32 to vector<16x1xf32>
    %268 = arith.addf %264, %267 : vector<16x1xf32>
    %269 = math.rsqrt %268 : vector<16x1xf32>
    %270 = vector.broadcast %269 : vector<16x1xf32> to vector<16x64xf32>
    %271 = arith.mulf %266, %270 : vector<16x64xf32>
    %272 = vector.broadcast %251 : vector<1x64xf32> to vector<16x64xf32>
    %273 = arith.mulf %271, %272 : vector<16x64xf32>
    %274 = vector.broadcast %253 : vector<1x64xf32> to vector<16x64xf32>
    %275 = arith.addf %273, %274 : vector<16x64xf32>
    %c0_150 = arith.constant 0 : index
    %c0_151 = arith.constant 0 : index
    %276 = vector.load %arg17[%c0_150, %c0_151] : memref<64x32xf32, #tpu.memory_space<vmem>>, vector<64x32xf32>
    %cst_152 = arith.constant dense<0.000000e+00> : vector<16x32xf32>
    %277 = tpu.matmul %275, %276, %cst_152 {dimension_numbers = #tpu.dot_dimension_numbers<[1], [0], [0], [1], [0, 0, 1, 1], [], []>} : vector<16x64xf32>, vector<64x32xf32>, vector<16x32xf32> -> vector<16x32xf32>
    %c0_153 = arith.constant 0 : index
    %c0_154 = arith.constant 0 : index
    %278 = vector.load %arg18[%c0_153, %c0_154] : memref<1x32xf32, #tpu.memory_space<vmem>>, vector<1x32xf32>
    %279 = vector.broadcast %278 : vector<1x32xf32> to vector<16x32xf32>
    %280 = arith.addf %277, %279 : vector<16x32xf32>
    %cst_155 = arith.constant 0.000000e+00 : f32
    %281 = vector.broadcast %cst_155 : f32 to vector<16x32xf32>
    %282 = arith.maximumf %280, %281 : vector<16x32xf32>
    %c0_156 = arith.constant 0 : index
    %c0_157 = arith.constant 0 : index
    %283 = vector.load %arg19[%c0_156, %c0_157] : memref<32x128xf32, #tpu.memory_space<vmem>>, vector<32x128xf32>
    %cst_158 = arith.constant dense<0.000000e+00> : vector<16x128xf32>
    %284 = tpu.matmul %282, %283, %cst_158 {dimension_numbers = #tpu.dot_dimension_numbers<[1], [0], [0], [1], [0, 0, 1, 1], [], []>} : vector<16x32xf32>, vector<32x128xf32>, vector<16x128xf32> -> vector<16x128xf32>
    %c0_159 = arith.constant 0 : index
    %c0_160 = arith.constant 0 : index
    %285 = vector.load %arg20[%c0_159, %c0_160] : memref<1x128xf32, #tpu.memory_space<vmem>>, vector<1x128xf32>
    %286 = vector.broadcast %285 : vector<1x128xf32> to vector<16x128xf32>
    %287 = arith.addf %284, %286 : vector<16x128xf32>
    %cst_161 = arith.constant dense<0xFF800000> : vector<16xf32>
    %288 = vector.multi_reduction <maximumf>, %287, %cst_161 [1] : vector<16x128xf32> to vector<16xf32>
    %289 = vector.shape_cast %288 : vector<16xf32> to vector<16x1xf32>
    %290 = vector.broadcast %289 : vector<16x1xf32> to vector<16x128xf32>
    %291 = arith.subf %287, %290 : vector<16x128xf32>
    %292 = math.exp %291 : vector<16x128xf32>
    %cst_162 = arith.constant dense<0.000000e+00> : vector<16xf32>
    %293 = vector.multi_reduction <add>, %292, %cst_162 [1] : vector<16x128xf32> to vector<16xf32>
    %294 = vector.shape_cast %293 : vector<16xf32> to vector<16x1xf32>
    %295 = tpu.reciprocal %294 {approx = true} : vector<16x1xf32> -> vector<16x1xf32>
    %296 = vector.broadcast %295 : vector<16x1xf32> to vector<16x128xf32>
    %297 = arith.mulf %292, %296 : vector<16x128xf32>
    %c0_163 = arith.constant 0 : index
    %c0_164 = arith.constant 0 : index
    %298 = vector.load %arg21[%c0_163, %c0_164] : memref<16x128xf32, #tpu.memory_space<vmem>>, vector<16x128xf32>
    tpu.vector_store %arg21[%c0_163, %c0_164], %297 {strides = array<i32>} : memref<16x128xf32, #tpu.memory_space<vmem>>, vector<16x128xf32>,
    return
  }
}

</mosaic_0001>

<bundles_post_ra>
// kernel: tpu_custom_call.1
= control target key start
LH: loop header
LB: loop body
LE: loop exit
PB: predicated region body
PF: predicated region fallthrough
CT: control target
= control target key end

     0   :  { %s5763_s0 = inlined_call_operand.vmem [shape: f32[16,10], index: 0, kind: input, shape index: {}]   ;;  %s5764_s1 = inlined_call_operand.vmem [shape: f32[16,64], index: 1, kind: input, shape index: {}]   ;;  %s5765_s2 = inlined_call_operand.vmem [shape: f32[64,16], index: 2, kind: input, shape index: {}]   ;;  %s5766_s3 = inlined_call_operand.vmem [shape: f32[10,32], index: 3, kind: input, shape index: {}]   ;;  %s5767_s4 = inlined_call_operand.vmem [shape: f32[1,32], index: 4, kind: input, shape index: {}]   ;;  %s5768_s5 = inlined_call_operand.vmem [shape: f32[32,64], index: 5, kind: input, shape index: {}]   ;;  %s5769_s6 = inlined_call_operand.vmem [shape: f32[1,64], index: 6, kind: input, shape index: {}]   ;;  %s5770_s7 = inlined_call_operand.vmem [shape: f32[2,64,192], index: 7, kind: input, shape index: {}]   ;;  %s5771_s8 = inlined_call_operand.vmem [shape: f32[2,1,192], index: 8, kind: input, shape index: {}]   ;;  %s5772_s9 = inlined_call_operand.vmem [shape: f32[2,64,64], index: 9, kind: input, shape index: {}]   ;;  %s5773_s10 = inlined_call_operand.vmem [shape: f32[2,1,64], index: 10, kind: input, shape index: {}]   ;;  %s5774_s11 = inlined_call_operand.vmem [shape: f32[2,64,256], index: 11, kind: input, shape index: {}]   ;;  %s5775_s12 = inlined_call_operand.vmem [shape: f32[2,1,256], index: 12, kind: input, shape index: {}]   ;;  %s5776_s13 = inlined_call_operand.vmem [shape: f32[2,256,64], index: 13, kind: input, shape index: {}]   ;;  %s5777_s14 = inlined_call_operand.vmem [shape: f32[2,1,64], index: 14, kind: input, shape index: {}]   ;;  %s5778_s15 = inlined_call_operand.vmem [shape: f32[2,2,1,64], index: 15, kind: input, shape index: {}]   ;;  %s5779_s16 = inlined_call_operand.vmem [shape: f32[2,2,1,64], index: 16, kind: input, shape index: {}]   ;;  %s5780_s17 = inlined_call_operand.vmem [shape: f32[64,32], index: 17, kind: input, shape index: {}]   ;;  %s5781_s18 = inlined_call_operand.vmem [shape: f32[1,32], index: 18, kind: input, shape index: {}]   ;;  %s5782_s19 = inlined_call_operand.vmem [shape: f32[32,128], index: 19, kind: input, shape index: {}]   ;;  %s5783_s20 = inlined_call_operand.vmem [shape: f32[1,128], index: 20, kind: input, shape index: {}]   ;;  %s5784_s21 = inlined_call_operand.hbm [shape: f32[16,128], index: 21, kind: output, shape index: {}]  }
   0x1   :  { %5795 = sst [smem:[#allocation5_spill]] %s5763_s0 }
   0x2   :  { %5796 = sst [smem:[#allocation6_spill]] %s5764_s1 }
   0x3   :  { %5797 = sst [smem:[#allocation7_spill]] %s5765_s2 }
   0x4   :  { %5798 = sst [smem:[#allocation8_spill]] %s5766_s3 }
   0x5   :  { %5799 = sst [smem:[#allocation9_spill]] %s5767_s4 }
   0x6   :  { %5800 = sst [smem:[#allocation10_spill]] %s5768_s5 }
   0x7   :  { %s5801_s26 = sld [smem:[#allocation8_spill]]  ;;  %vm87_vm0 = vcmask 1041408   ;;  %s5802_s0 = sld [smem:[#allocation5_spill]]  ;;  %vm4752_vm1 = vmmov 1   ;;  %vm80_vm3 = vcmask 80896  }
   0x8   :  { %vm4268_vm2 = vmpackc.low %vm87_vm0, %vm4752_vm1  ;;  %s5803_s5 = sld [smem:[#allocation10_spill]] }
   0xd   :  { %v71_v0 = vld [vmem:[%s5801_s26] sm:$0xff]  ;;  %v72_v1 = vld [vmem:[%s5801_s26 + $0x8] sm:$0x3] }
   0xe   :  { %v69_v2 = vld [vmem:[%s5802_s0] sm:$0xff]  ;;  %v4267_v3 = vpack.c.bf16 %v72_v1, %v71_v0  ;;  %v169_v5 = vld [vmem:[%s5803_s5 + $0x8] sm:$0xff] }
   0xf   :  { %v168_v4 = vld [vmem:[%s5803_s5] sm:$0xff]  ;;  %4055 = vmatprep.mubr.msk.f32.mxu0 %vm80_vm3, %v69_v2 }
  0x10   :  { %26 = vsyncpa [#allocation3], 0  ;;  %4269 = vmatprep.subr.msk.bf16.mxu0 %vm4268_vm2, %v4267_v3  ;;  %v4273_v6 = vpack.c.bf16 %v169_v5, %v168_v4  ;;  %v70_v7 = vld [vmem:[%s5802_s0 + $0x8] sm:$0xff]  ;;  %v170_v8 = vld [vmem:[%s5803_s5 + $0x10] sm:$0xff]  ;;  %s5804_s2 = sld [smem:[#allocation9_spill]]  ;;  %vm179_vm4 = vcmask 261120   ;;  %v291_v52 = vlaneseq }
  0x11   :  { %4272 = vmatpush3.bf16.msk.msra.mxu0 %vm4268_vm2, %v4267_v3  ;;  %v171_v9 = vld [vmem:[%s5803_s5 + $0x18] sm:$0xff]  ;;  %v274_v11 = vld [vmem:[%s5770_s7 + $0x8] sm:$0xff]  ;;  %v273_v13 = vld [vmem:[%s5770_s7] sm:$0xff]  ;;  %v4753_v42 = vmov 0.0   ;;  %s5805_s1 = sld [smem:[#allocation6_spill]]  ;;  %vm301_vm5 = vcmask 523264  }
  0x12   :  { %4274 = vmatprep.subr.bf16.mxu1 %v4273_v6  ;;  %v4277_v10 = vpack.c.bf16 %v171_v9, %v170_v8  ;;  %v276_v12 = vld [vmem:[%s5770_s7 + $0x18] sm:$0xff]  ;;  %v275_v15 = vld [vmem:[%s5770_s7 + $0x10] sm:$0xff]  ;;  %v278_v16 = vld [vmem:[%s5770_s7 + $0x28] sm:$0xff]  ;;  %v292_v53 = vshrl.u32 %v291_v52, 7  ;;  %vm391_vm6 = vcmask 130048   ;;  %s4754_s26 = smov 112  }
  0x13   :  { %4276 = vmatpush3.bf16.msra.mxu1 %v4273_v6  ;;  %v4281_v14 = vpack.c.bf16 %v276_v12, %v274_v11  ;;  %v280_v17 = vld [vmem:[%s5770_s7 + $0x38] sm:$0xff]  ;;  %v4283_v18 = vpack.c.bf16 %v275_v15, %v273_v13  ;;  %v277_v20 = vld [vmem:[%s5770_s7 + $0x20] sm:$0xff]  ;;  %v279_v21 = vld [vmem:[%s5770_s7 + $0x30] sm:$0xff]  ;;  %s4755_s27 = smov 64   ;;  %s5794_s3 = smov 16  }
  0x14   :  { %4056 = vmatmul.mubr.msk.f32.vlgmr.msra.gmra.mrb[0].mxu0 %vm80_vm3, %v70_v7  ;;  %4278 = vmatprep.subr.bf16.mxu1 %v4277_v10  ;;  %v4285_v19 = vpack.c.bf16 %v280_v17, %v278_v16  ;;  %v282_v22 = vld [vmem:[%s5770_s7 + $0x48] sm:$0xff]  ;;  %v284_v23 = vld [vmem:[%s5770_s7 + $0x58] sm:$0xff]  ;;  %v4287_v24 = vpack.c.bf16 %v279_v21, %v277_v20  ;;  %v281_v26 = vld [vmem:[%s5770_s7 + $0x40] sm:$0xff]  ;;  %v4970_v54 = vsub.s32 0, %v292_v53  ;;  %v4976_v57 = vsub.s32 1, %v292_v53  ;;  %s4757_s28 = smov 48  }
  0x15   :  { %4282 = vmatprep.subr.bf16.mxu0 %v4281_v14  ;;  %v4289_v25 = vpack.c.bf16 %v284_v23, %v282_v22  ;;  %v283_v27 = vld [vmem:[%s5770_s7 + $0x50] sm:$0xff]  ;;  %v286_v36 = vld [vmem:[%s5770_s7 + $0x68] sm:$0xff]  ;;  %v288_v37 = vld [vmem:[%s5770_s7 + $0x78] sm:$0xff]  ;;  %372 = vmatprep.mubr.f32.mxu0 %v4753_v42  ;;  %s5792_s29 = smov 96   ;;  %s4759_s0 = smov 32  }
  0x16   :  { %4284 = vmatpush1.bf16.msra.mxu0 %v4283_v18  ;;  %v4291_v28 = vpack.c.bf16 %v283_v27, %v281_v26  ;;  %v3674_v29 = vld [vmem:[%s5804_s2] ss:$0 sm:$0xff]  ;;  %v4293_v38 = vpack.c.bf16 %v288_v37, %v286_v36  ;;  %v287_v40 = vld [vmem:[%s5770_s7 + $0x70] sm:$0xff]  ;;  %s5790_s4 = smov 80   ;;  %vm4994_vm7 = vmpackc.low %vm391_vm6, %vm391_vm6  ;;  %s5808_s23 = sld [smem:[#allocation7_spill]] }
  0x17   :  { %4280 = vmatpush3.bf16.msra.mxu1 %v4277_v10  ;;  %4286 = vmatprep.subr.bf16.mxu0 %v4285_v19  ;;  %v285_v39 = vld [vmem:[%s5770_s7 + $0x60] sm:$0xff]  ;;  %v262_v50 = vld [vmem:[%s5805_s1 + $0x8] sm:$0xff]  ;;  %s5811_s24 = smov 80  }
  0x18   :  { %v4295_v41 = vpack.c.bf16 %v287_v40, %v285_v39  ;;  %v3678_v43 = vld [vmem:[%s5769_s6] ss:$0 sm:$0xff] }
  0x19   :  { %v261_v46 = vld [vmem:[%s5805_s1] sm:$0xff]  ;;  %s5810_s1 = smov 96  }
  0x1a   :  { %4288 = vmatpush1.bf16.msra.mxu0 %v4287_v24  ;;  %v289_v55 = vld [vmem:[%s5771_s8] sm:$0x3] }
  0x1b   :  { %4290 = vmatprep.subr.bf16.mxu0 %v4289_v25  ;;  %v294_v56 = vrot.slane %v289_v55, %v4970_v54  ;;  %v298_v61 = vrot.slane %v289_v55, %v4976_v57 }
  0x1c   :  { %v5038_v37 = vld [vmem:[%s5808_s23 + $0x10] sm:$0xff]  ;;  %v269_v39 = vld [vmem:[%s5808_s23 + $0x20] sm:$0xff]  ;;  %v5046_v40 = vld [vmem:[%s5808_s23 + $0x18] sm:$0xff] }
  0x1d   :  { %v5060_v53 = vld [vmem:[%s5808_s23 + $0x30] sm:$0xff] }
  0x1e   :  { %4292 = vmatpush1.bf16.msra.mxu0 %v4291_v28 }
  0x1f   :  { %4294 = vmatprep.subr.bf16.mxu0 %v4293_v38 }
  0x22   :  { %4296 = vmatpush1.bf16.msra.mxu0 %v4295_v41 }
  0xe7   :  { %v4057_v30 = vpop.f32.mrb[0].mxu0 }
  0xe8   :  { %v163_v31 = vadd.f32 %v4057_v30, %v3674_v29  ;;  %v157_v32 = vpop.f32.mrb[1].mxu0  ;;  %v5029_v30 = vld [vmem:[%s5808_s23] sm:$0xff] }
  0xe9   :  { %v158_v33 = vadd.f32 %v3674_v29, %v157_v32  ;;  %v5024_v29 = vld [vmem:[%s5808_s23 + $0x8] sm:$0xff] }
  0xea   :  { %v167_v35 = vmax.f32 %v163_v31, 0.0 }
  0xeb   :  { %v166_v34 = vmax.f32 %v158_v33, 0.0 }
  0xed   :  { %4066 = vmatprep.mubr.msk.f32.mxu1 %vm179_vm4, %v166_v34 }
  0xee   :  { %4067 = vmatmul.mubr.msk.f32.vlgmr.msra.gmra.mrb[0].mxu1 %vm179_vm4, %v167_v35 }
 0x1c1   :  { %v4068_v44 = vpop.f32.mrb[0].mxu1 }
 0x1c2   :  { %v252_v45 = vpop.f32.mrb[1].mxu1  ;;  %v258_v48 = vadd.f32 %v4068_v44, %v3678_v43 }
 0x1c3   :  { %v253_v47 = vadd.f32 %v3678_v43, %v252_v45 }
 0x1c4   :  { %v4966_v51 = vadd.f32 %v262_v50, %v258_v48  ;;  %v5054_v50 = vld [vmem:[%s5808_s23 + $0x28] sm:$0xff] }
 0x1c5   :  { %v4958_v49 = vadd.f32 %v261_v46, %v253_v47 }
 0x1c7   :  { %3681 = vmatmul.mubr.msk.f32.vlgmr.msra.gmra.mrb[2].mxu0 %vm301_vm5, %v4958_v49 }
 0x1c8   :  { %378 = vmatprep.mubr.f32.mxu0 %v4753_v42 }
 0x1cb   :  { %3682 = vmatmul.mubr.msk.f32.gmra.mrb[4].mxu0 %vm301_vm5, %v4966_v51 }
 0x29a   :  { %v374_v58 = vpop.f32.mrb[2].mxu0 }
 0x29b   :  { %v375_v59 = vadd.f32 %v374_v58, %v294_v56  ;;  %v376_v60 = vpop.f32.mrb[3].mxu0 }
 0x29c   :  { %v377_v1 = vadd.f32 %v376_v60, %v298_v61 }
 0x29d   :  { %475 = vrot.lane.b32.xlu1 %v375_v59, %s4754_s26  ;;  %4073 = vmatprep.mubr.msk.f32.mxu1 %vm391_vm6, %v375_v59 }
 0x29e   :  { %v380_v62 = vpop.f32.mrb[4].mxu0 }
 0x29f   :  { %v381_v63 = vadd.f32 %v380_v62, %v294_v56  ;;  %v382_v0 = vpop.f32.mrb[5].mxu0 }
 0x2a0   :  { %v383_v2 = vadd.f32 %v382_v0, %v298_v61 }
 0x2a1   :  { %477 = vrot.lane.b32.xlu1 %v381_v63, %s4754_s26  ;;  %v4569_v3 = vpack.i.bf16 %v381_v63, %v375_v59 }
 0x2a2   :  { %v4321_v4 = vpack.c.bf16 %v383_v2, %v377_v1  ;;  %v4982_v5 = vpack.i.bf16 %v383_v2, %v377_v1 }
 0x2a3   :  { %4570 = vrot.lane.b32.xlu0 %v4569_v3, %s4755_s27 }
 0x2a5   :  { %4585 = vrot.lane.b32.xlu1 %v4569_v3, %s5794_s3 }
 0x2a7   :  { %4575 = vrot.lane.b32.xlu0 %v4569_v3, %s4757_s28 }
 0x2a9   :  { %568 = vrot.lane.b32.xlu1 %v381_v63, %s5792_s29 }
 0x2ab   :  { %4580 = vrot.lane.b32.xlu0 %v4569_v3, %s4759_s0 }
 0x2ad   :  { %659 = vrot.lane.b32.xlu1 %v381_v63, %s5790_s4 }
 0x2af   :  { %566 = vrot.lane.b32.xlu0 %v375_v59, %s5792_s29 }
 0x2b3   :  { %657 = vrot.lane.b32.xlu0 %v375_v59, %s5790_s4  ;;  %v5067_v59 = vld [vmem:[%s5808_s23 + $0x38] sm:$0xff] }
 0x30f   :  { %v476_v6 = vpop.permute.xlu1 %475 }
 0x313   :  { %v478_v8 = vpop.permute.xlu1 %477 }
 0x315   :  { %v4571_v7 = vpop.permute.xlu0 %4570 }
 0x316   :  { %v4573_v9 = vunpack.i.h.bf16 %v4571_v7  ;;  %v4572_v10 = vunpack.i.l.bf16 %v4571_v7 }
 0x317   :  { %v4586_v16 = vpop.permute.xlu1 %4585 }
 0x318   :  { %v4297_v12 = vpack.c.bf16 %v4573_v9, %v4572_v10  ;;  %v4588_v21 = vunpack.i.h.bf16 %v4586_v16  ;;  %v4587_v22 = vunpack.i.l.bf16 %v4586_v16 }
 0x319   :  { %v4576_v13 = vpop.permute.xlu0 %4575 }
 0x31a   :  { %v4578_v14 = vunpack.i.h.bf16 %v4576_v13  ;;  %v4577_v15 = vunpack.i.l.bf16 %v4576_v13  ;;  %4299 = vmatprep.subr.msk.bf16.mxu1 %vm4994_vm7, %v4297_v12  ;;  %v4315_v25 = vpack.c.bf16 %v4588_v21, %v4587_v22 }
 0x31b   :  { %4302 = vmatpush3.bf16.xpose.msk.msra.mxu1 %vm4994_vm7, %v4297_v12  ;;  %v569_v26 = vpop.permute.xlu1 %568 }
 0x31c   :  { %v4303_v17 = vpack.c.bf16 %v4578_v14, %v4577_v15 }
 0x31d   :  { %v4581_v18 = vpop.permute.xlu0 %4580 }
 0x31e   :  { %v4583_v19 = vunpack.i.h.bf16 %v4581_v18  ;;  %v4582_v20 = vunpack.i.l.bf16 %v4581_v18  ;;  %4305 = vmatprep.subr.msk.bf16.mxu1 %vm4994_vm7, %v4303_v17 }
 0x31f   :  { %v660_v28 = vpop.permute.xlu1 %659 }
 0x320   :  { %v4309_v23 = vpack.c.bf16 %v4583_v19, %v4582_v20 }
 0x321   :  { %v567_v24 = vpop.permute.xlu0 %566 }
 0x322   :  { %4074 = vmatmul.mubr.msk.f32.vlgmr.msra.gmra.mrb[2].mxu1 %vm391_vm6, %v381_v63  ;;  %4311 = vmatprep.subr.msk.bf16.mxu0 %vm4994_vm7, %v4309_v23 }
 0x323   :  { %4087 = vmatprep.mubr.msk.f32.mxu0 %vm391_vm6, %v567_v24  ;;  %4308 = vmatpush3.bf16.xpose.msk.msra.mxu1 %vm4994_vm7, %v4303_v17 }
 0x324   :  { %4080 = vmatprep.mubr.msk.f32.mxu1 %vm391_vm6, %v476_v6  ;;  %4314 = vmatpush3.bf16.xpose.msk.msra.mxu0 %vm4994_vm7, %v4309_v23 }
 0x325   :  { %4317 = vmatprep.subr.msk.bf16.mxu1 %vm4994_vm7, %v4315_v25  ;;  %4322 = vmatprep.subr.bf16.mxu0 %v4321_v4  ;;  %v658_v27 = vpop.permute.xlu0 %657 }
 0x32a   :  { %4081 = vmatmul.mubr.msk.f32.vlgmr.msra.gmra.mrb[4].mxu1 %vm391_vm6, %v478_v8 }
 0x32b   :  { %4088 = vmatmul.mubr.msk.f32.vlgmr.msra.gmra.mrb[6].mxu0 %vm391_vm6, %v569_v26  ;;  %4320 = vmatpush3.bf16.xpose.msk.msra.mxu1 %vm4994_vm7, %v4315_v25 }
 0x32c   :  { %4094 = vmatprep.mubr.msk.f32.mxu1 %vm391_vm6, %v658_v27  ;;  %4324 = vmatpush3.bf16.msra.mxu0 %v4321_v4 }
 0x332   :  { %4095 = vmatmul.mubr.msk.f32.vlgmr.msra.gmra.mrb[6].mxu1 %vm391_vm6, %v660_v28 }
 0x3f5   :  { %v4075_v31 = vpop.f32.mrb[2].mxu1 }
 0x3f6   :  { %v749_v32 = vadd.f32 %v4075_v31, %v5024_v29  ;;  %v466_v33 = vpop.f32.mrb[3].mxu1 }
 0x3f7   :  { %v748_v34 = vadd.f32 %v466_v33, %v5029_v30 }
 0x3f8   :  { %v759_v35 = vsel %vm391_vm6, %v749_v32, -inf }
 0x3f9   :  { %760 = vmax.xlane.f32.xlu1 %v759_v35  ;;  %v756_v36 = vsel %vm391_vm6, %v748_v34, -inf }
 0x3fa   :  { %757 = vmax.xlane.f32.xlu0 %v756_v36 }
 0x3fd   :  { %v4082_v38 = vpop.f32.mrb[4].mxu1 }
 0x3fe   :  { %v4089_v41 = vpop.f32.mrb[6].mxu0  ;;  %v557_v43 = vpop.f32.mrb[5].mxu1  ;;  %v751_v47 = vadd.f32 %v4082_v38, %v5046_v40 }
 0x3ff   :  { %v750_v44 = vadd.f32 %v557_v43, %v5038_v37  ;;  %v648_v45 = vpop.f32.mrb[7].mxu0  ;;  %v753_v55 = vadd.f32 %v4089_v41, %v5054_v50 }
 0x400   :  { %v752_v46 = vadd.f32 %v648_v45, %v269_v39  ;;  %v765_v58 = vsel %vm391_vm6, %v751_v47, -inf }
 0x401   :  { %v762_v48 = vsel %vm391_vm6, %v750_v44, -inf  ;;  %v771_v63 = vsel %vm391_vm6, %v753_v55, -inf }
 0x402   :  { %v768_v52 = vsel %vm391_vm6, %v752_v46, -inf  ;;  %763 = vmax.xlane.f32.xlu0 %v762_v48 }
 0x403   :  { %769 = vmax.xlane.f32.xlu1 %v768_v52 }
 0x405   :  { %v4096_v56 = vpop.f32.mrb[6].mxu1 }
 0x406   :  { %766 = vmax.xlane.f32.xlu0 %v765_v58  ;;  %v739_v60 = vpop.f32.mrb[7].mxu1  ;;  %v755_v62 = vadd.f32 %v4096_v56, %v5067_v59 }
 0x407   :  { %v754_v61 = vadd.f32 %v739_v60, %v5060_v53 }
 0x408   :  { %v777_v1 = vsel %vm391_vm6, %v755_v62, -inf }
 0x409   :  { %v774_v0 = vsel %vm391_vm6, %v754_v61, -inf }
 0x40a   :  { %772 = vmax.xlane.f32.xlu0 %v771_v63  ;;  %775 = vmax.xlane.f32.xlu1 %v774_v0 }
 0x40e   :  { %778 = vmax.xlane.f32.xlu0 %v777_v1 }
 0x486   :  { %v761_v2 = vpop.xlane.xlu1 %760 }
 0x487   :  { %v781_v3 = vsub.f32 %v749_v32, %v761_v2  ;;  %v758_v4 = vpop.xlane.xlu0 %757 }
 0x488   :  { %v780_v6 = vsub.f32 %v748_v34, %v758_v4 }
 0x489   :  { %v790_v7 = vmul.f32 1.442695, %v781_v3 }
 0x48a   :  { %v788_v8 = vmul.f32 1.442695, %v780_v6 }
 0x48b   :  { %4639 = vpow2.f32 %v790_v7 }
 0x48c   :  { %4641 = vpow2.f32 %v788_v8 }
 0x48f   :  { %v764_v9 = vpop.xlane.xlu0 %763 }
 0x490   :  { %v770_v10 = vpop.xlane.xlu1 %769  ;;  %v782_v12 = vsub.f32 %v750_v44, %v764_v9 }
 0x491   :  { %v784_v13 = vsub.f32 %v752_v46, %v770_v10 }
 0x492   :  { %v792_v15 = vmul.f32 1.442695, %v782_v12 }
 0x493   :  { %v796_v14 = vmul.f32 1.442695, %v784_v13  ;;  %v767_v16 = vpop.xlane.xlu0 %766 }
 0x494   :  { %v783_v19 = vsub.f32 %v751_v47, %v767_v16 }
 0x495   :  { %v4640_v17 = vpop.eup %4639  ;;  %4643 = vpow2.f32 %v796_v14 }
 0x496   :  { %v4642_v18 = vpop.eup %4641  ;;  %v807_v20 = vsel %vm391_vm6, %v4640_v17, 0.0  ;;  %4645 = vpow2.f32 %v792_v15  ;;  %v794_v24 = vmul.f32 1.442695, %v783_v19 }
 0x497   :  { %v773_v21 = vpop.xlane.xlu0 %772  ;;  %808 = vadd.xlane.f32.xlu0 %v807_v20  ;;  %v804_v22 = vsel %vm391_vm6, %v4642_v18, 0.0  ;;  %v776_v26 = vpop.xlane.xlu1 %775 }
 0x498   :  { %v785_v23 = vsub.f32 %v753_v55, %v773_v21  ;;  %805 = vadd.xlane.f32.xlu1 %v804_v22  ;;  %v786_v31 = vsub.f32 %v754_v61, %v776_v26 }
 0x49a   :  { %v798_v25 = vmul.f32 1.442695, %v785_v23  ;;  %v800_v36 = vmul.f32 1.442695, %v786_v31  ;;  %v846_v31 = vld [vmem:[%s5772_s9 + $0x10] sm:$0xff] }
 0x49b   :  { %v779_v27 = vpop.xlane.xlu0 %778 }
 0x49c   :  { %4647 = vpow2.f32 %v798_v25  ;;  %v787_v28 = vsub.f32 %v755_v62, %v779_v27 }
 0x49d   :  { %4649 = vpow2.f32 %v794_v24 }
 0x49e   :  { %v802_v32 = vmul.f32 1.442695, %v787_v28 }
 0x49f   :  { %v4644_v33 = vpop.eup %4643 }
 0x4a0   :  { %v816_v34 = vsel %vm391_vm6, %v4644_v33, 0.0  ;;  %v4646_v35 = vpop.eup %4645  ;;  %4651 = vpow2.f32 %v802_v32  ;;  %v847_v32 = vld [vmem:[%s5772_s9 + $0x18] sm:$0xff] }
 0x4a1   :  { %817 = vadd.xlane.f32.xlu1 %v816_v34  ;;  %v810_v38 = vsel %vm391_vm6, %v4646_v35, 0.0  ;;  %4653 = vpow2.f32 %v800_v36  ;;  %v844_v34 = vld [vmem:[%s5772_s9] sm:$0xff] }
 0x4a5   :  { %811 = vadd.xlane.f32.xlu1 %v810_v38 }
 0x4a6   :  { %v5078_v39 = vpop.eup %4647 }
 0x4a7   :  { %v819_v41 = vsel %vm391_vm6, %v5078_v39, 0.0  ;;  %v4650_v43 = vpop.eup %4649 }
 0x4a8   :  { %820 = vadd.xlane.f32.xlu0 %v819_v41  ;;  %v813_v44 = vsel %vm391_vm6, %v4650_v43, 0.0  ;;  %v848_v41 = vld [vmem:[%s5772_s9 + $0x20] sm:$0xff] }
 0x4aa   :  { %v5083_v45 = vpop.eup %4651 }
 0x4ab   :  { %v825_v46 = vsel %vm391_vm6, %v5083_v45, 0.0  ;;  %v4654_v47 = vpop.eup %4653 }
 0x4ac   :  { %814 = vadd.xlane.f32.xlu0 %v813_v44  ;;  %v822_v48 = vsel %vm391_vm6, %v4654_v47, 0.0 }
 0x4b0   :  { %826 = vadd.xlane.f32.xlu0 %v825_v46 }
 0x4b4   :  { %823 = vadd.xlane.f32.xlu0 %v822_v48  ;;  %v851_v48 = vld [vmem:[%s5772_s9 + $0x38] sm:$0xff] }
 0x4b6   :  { %4590 = vrot.lane.b32.xlu1 %v4982_v5, %s4754_s26 }
 0x4ba   :  { %4600 = vrot.lane.b32.xlu1 %v4982_v5, %s5790_s4 }
 0x4ca   :  { %4595 = vrot.lane.b32.xlu0 %v4982_v5, %s5792_s29 }
 0x524   :  { %v809_v52 = vpop.xlane.xlu0 %808 }
 0x525   :  { %4655 = vrcp.f32 %v809_v52  ;;  %v806_v55 = vpop.xlane.xlu1 %805 }
 0x526   :  { %4657 = vrcp.f32 %v806_v55 }
 0x52e   :  { %v818_v56 = vpop.xlane.xlu1 %817 }
 0x52f   :  { %v4656_v58 = vpop.eup %4655 }
 0x530   :  { %v4658_v60 = vpop.eup %4657  ;;  %v837_v62 = vmul.f32 %v4656_v58, %v4640_v17 }
 0x531   :  { %v836_v61 = vmul.f32 %v4658_v60, %v4642_v18 }
 0x532   :  { %v812_v63 = vpop.xlane.xlu1 %811 }
 0x533   :  { %4659 = vrcp.f32 %v812_v63  ;;  %4101 = vmatprep.mubr.msk.f32.mxu0 %vm391_vm6, %v836_v61  ;;  %v3715_v61 = vld [vmem:[%s5773_s10] ss:$0 sm:$0xff] }
 0x534   :  { %4102 = vmatmul.mubr.msk.f32.vlgmr.msra.gmra.mrb[8].mxu0 %vm391_vm6, %v837_v62  ;;  %4661 = vrcp.f32 %v818_v56 }
 0x535   :  { %v821_v0 = vpop.xlane.xlu0 %820 }
 0x536   :  { %v4591_v1 = vpop.permute.xlu1 %4590 }
 0x537   :  { %v4593_v2 = vunpack.i.h.bf16 %v4591_v1  ;;  %v4592_v3 = vunpack.i.l.bf16 %v4591_v1 }
 0x539   :  { %v4325_v5 = vpack.c.bf16 %v4593_v2, %v4592_v3  ;;  %v815_v4 = vpop.xlane.xlu0 %814 }
 0x53a   :  { %4663 = vrcp.f32 %v815_v4  ;;  %v4601_v12 = vpop.permute.xlu1 %4600 }
 0x53b   :  { %4326 = vmatprep.subr.bf16.mxu0 %v4325_v5  ;;  %4665 = vrcp.f32 %v821_v0  ;;  %v4603_v17 = vunpack.i.h.bf16 %v4601_v12  ;;  %v4602_v18 = vunpack.i.l.bf16 %v4601_v12 }
 0x53c   :  { %4328 = vmatpush3.bf16.msra.mxu0 %v4325_v5 }
 0x53d   :  { %v4660_v6 = vpop.eup %4659  ;;  %v827_v7 = vpop.xlane.xlu0 %826  ;;  %v4345_v23 = vpack.c.bf16 %v4603_v17, %v4602_v18  ;;  %v1580_v18 = vld [vmem:[%s5774_s11] sm:$0xff] }
 0x53e   :  { %v838_v8 = vmul.f32 %v4660_v6, %v4646_v35  ;;  %v4662_v10 = vpop.eup %4661  ;;  %v845_v35 = vld [vmem:[%s5772_s9 + $0x8] sm:$0xff] }
 0x53f   :  { %v840_v16 = vmul.f32 %v4662_v10, %v4644_v33  ;;  %v4329_v33 = vpack.c.bf16 %v847_v32, %v846_v31  ;;  %v4333_v36 = vpack.c.bf16 %v845_v35, %v844_v34  ;;  %v1588_v32 = vld [vmem:[%s5774_s11 + $0x40] sm:$0xff]  ;;  %v1593_v35 = vld [vmem:[%s5774_s11 + $0x68] sm:$0xff] }
 0x540   :  { %4108 = vmatprep.mubr.msk.f32.mxu0 %vm391_vm6, %v838_v8 }
 0x541   :  { %v824_v9 = vpop.xlane.xlu0 %823  ;;  %4330 = vmatprep.subr.bf16.mxu1 %v4329_v33 }
 0x542   :  { %4667 = vrcp.f32 %v824_v9  ;;  %4332 = vmatpush3.bf16.msra.mxu1 %v4329_v33  ;;  %v1590_v33 = vld [vmem:[%s5774_s11 + $0x50] sm:$0xff] }
 0x543   :  { %4669 = vrcp.f32 %v827_v7  ;;  %4334 = vmatprep.subr.bf16.mxu1 %v4333_v36  ;;  %v4363_v34 = vpack.c.bf16 %v1590_v33, %v1588_v32 }
 0x544   :  { %v4664_v13 = vpop.eup %4663 }
 0x545   :  { %v839_v14 = vmul.f32 %v4664_v13, %v4650_v43  ;;  %v4596_v15 = vpop.permute.xlu0 %4595  ;;  %v4666_v22 = vpop.eup %4665  ;;  %v849_v43 = vld [vmem:[%s5772_s9 + $0x28] sm:$0xff] }
 0x546   :  { %v4598_v19 = vunpack.i.h.bf16 %v4596_v15  ;;  %v4597_v20 = vunpack.i.l.bf16 %v4596_v15  ;;  %v841_v25 = vmul.f32 %v4666_v22, %v5078_v39  ;;  %v4341_v46 = vpack.c.bf16 %v849_v43, %v848_v41  ;;  %v1581_v15 = vld [vmem:[%s5774_s11 + $0x8] sm:$0xff]  ;;  %v1587_v22 = vld [vmem:[%s5774_s11 + $0x38] sm:$0xff]  ;;  %v1594_v41 = vld [vmem:[%s5774_s11 + $0x70] sm:$0xff] }
 0x547   :  { %4109 = vmatmul.mubr.msk.f32.vlgmr.msra.gmra.mrb[10].mxu0 %vm391_vm6, %v839_v14 }
 0x548   :  { %v4337_v21 = vpack.c.bf16 %v4598_v19, %v4597_v20  ;;  %4129 = vmatprep.mubr.msk.f32.mxu0 %vm391_vm6, %v840_v16  ;;  %v1583_v16 = vld [vmem:[%s5774_s11 + $0x18] sm:$0xff]  ;;  %v1582_v19 = vld [vmem:[%s5774_s11 + $0x10] sm:$0xff] }
 0x549   :  { %v4353_v17 = vpack.c.bf16 %v1583_v16, %v1581_v15  ;;  %v4355_v20 = vpack.c.bf16 %v1582_v19, %v1580_v18  ;;  %v1703_v15 = vld [vmem:[%s5776_s13 + $0x40] sm:$0xff]  ;;  %v1704_v16 = vld [vmem:[%s5776_s13 + $0x48] sm:$0xff]  ;;  %v1722_v18 = vld [vmem:[%s5776_s13 + $0xd8] sm:$0xff] }
 0x54a   :  { %4338 = vmatprep.subr.bf16.mxu0 %v4337_v21  ;;  %v4387_v19 = vpack.c.bf16 %v1704_v16, %v1703_v15  ;;  %v3720_v15 = vld [vmem:[%s5777_s14] ss:$0 sm:$0xff] }
 0x54b   :  { %4340 = vmatpush3.bf16.msra.mxu0 %v4337_v21  ;;  %v1585_v21 = vld [vmem:[%s5774_s11 + $0x28] sm:$0xff] }
 0x54c   :  { %v4668_v24 = vpop.eup %4667  ;;  %4346 = vmatprep.subr.bf16.mxu0 %v4345_v23 }
 0x54d   :  { %v4670_v26 = vpop.eup %4669  ;;  %v842_v27 = vmul.f32 %v4668_v24, %v4654_v47  ;;  %v850_v47 = vld [vmem:[%s5772_s9 + $0x30] sm:$0xff]  ;;  %v1584_v24 = vld [vmem:[%s5774_s11 + $0x20] sm:$0xff] }
 0x54e   :  { %4130 = vmatmul.mubr.msk.f32.vlgmr.msra.gmra.mrb[12].mxu0 %vm391_vm6, %v841_v25  ;;  %v843_v28 = vmul.f32 %v4670_v26, %v5083_v45  ;;  %v4349_v56 = vpack.c.bf16 %v851_v48, %v850_v47  ;;  %v1586_v25 = vld [vmem:[%s5774_s11 + $0x30] sm:$0xff]  ;;  %v1696_v48 = vld [vmem:[%s5776_s13 + $0x8] sm:$0xff] }
 0x54f   :  { %4348 = vmatpush3.bf16.msra.mxu0 %v4345_v23  ;;  %4143 = vmatprep.mubr.msk.f32.mxu0 %vm391_vm6, %v842_v27  ;;  %v4357_v23 = vpack.c.bf16 %v1587_v22, %v1585_v21  ;;  %v4359_v26 = vpack.c.bf16 %v1586_v25, %v1584_v24  ;;  %v1589_v27 = vld [vmem:[%s5774_s11 + $0x48] sm:$0xff]  ;;  %v1705_v21 = vld [vmem:[%s5776_s13 + $0x50] sm:$0xff]  ;;  %v1706_v22 = vld [vmem:[%s5776_s13 + $0x58] sm:$0xff] }
 0x550   :  { %4354 = vmatprep.subr.bf16.mxu0 %v4353_v17  ;;  %v1721_v17 = vld [vmem:[%s5776_s13 + $0xd0] sm:$0xff]  ;;  %v1724_v24 = vld [vmem:[%s5776_s13 + $0xe8] sm:$0xff]  ;;  %v4391_v25 = vpack.c.bf16 %v1706_v22, %v1705_v21 }
 0x552   :  { %4144 = vmatmul.mubr.msk.f32.vlgmr.msra.gmra.mrb[14].mxu0 %vm391_vm6, %v843_v28  ;;  %v1591_v28 = vld [vmem:[%s5774_s11 + $0x58] sm:$0xff] }
 0x553   :  { %1678 = vmatprep.mubr.f32.mxu0 %v4753_v42  ;;  %4356 = vmatpush1.bf16.msra.mxu0 %v4355_v20  ;;  %v4361_v31 = vpack.c.bf16 %v1591_v28, %v1589_v27  ;;  %v4389_v20 = vpack.c.bf16 %v1722_v18, %v1721_v17 }
 0x554   :  { %4358 = vmatprep.subr.bf16.mxu0 %v4357_v23  ;;  %v1723_v23 = vld [vmem:[%s5776_s13 + $0xe0] sm:$0xff] }
 0x557   :  { %4360 = vmatpush1.bf16.msra.mxu0 %v4359_v26  ;;  %v4393_v26 = vpack.c.bf16 %v1724_v24, %v1723_v23 }
 0x558   :  { %4362 = vmatprep.subr.bf16.mxu0 %v4361_v31 }
 0x55b   :  { %4364 = vmatpush1.bf16.msra.mxu0 %v4363_v34 }
 0x607   :  { %v4103_v38 = vpop.f32.mrb[8].mxu0 }
 0x608   :  { %v924_v39 = vpop.f32.mrb[9].mxu0 }
 0x61a   :  { %v4110_v44 = vpop.f32.mrb[10].mxu0 }
 0x61b   :  { %v1013_v45 = vpop.f32.mrb[11].mxu0 }
 0x61c   :  { %4115 = vmatprep.mubr.msk.f32.mxu1 %vm391_vm6, %v1013_v45  ;;  %v1712_v45 = vld [vmem:[%s5776_s13 + $0x88] sm:$0xff] }
 0x61d   :  { %4116 = vmatmul.mubr.msk.f32.vlgmr.msra.gmra.mrb[8].mxu1 %vm391_vm6, %v4110_v44  ;;  %v1711_v44 = vld [vmem:[%s5776_s13 + $0x80] sm:$0xff] }
 0x61e   :  { %4336 = vmatpush3.bf16.msra.mxu1 %v4333_v36  ;;  %4122 = vmatprep.mubr.msk.f32.mxu1 %vm391_vm6, %v924_v39  ;;  %v1595_v36 = vld [vmem:[%s5774_s11 + $0x78] sm:$0xff]  ;;  %v4369_v47 = vpack.c.bf16 %v1712_v45, %v1711_v44 }
 0x61f   :  { %4342 = vmatprep.subr.bf16.mxu1 %v4341_v46  ;;  %v4365_v39 = vpack.c.bf16 %v1595_v36, %v1593_v35  ;;  %v3716_v36 = vld [vmem:[%s5778_s15] ss:$0 sm:$0xff] }
 0x621   :  { %v4131_v52 = vpop.f32.mrb[12].mxu0  ;;  %4366 = vmatprep.subr.bf16.mxu0 %v4365_v39  ;;  %v3717_v39 = vld [vmem:[%s5779_s16] ss:$0 sm:$0xff] }
 0x622   :  { %v1262_v55 = vpop.f32.mrb[13].mxu0 }
 0x625   :  { %4123 = vmatmul.mubr.msk.f32.vlgmr.msra.gmra.mrb[8].mxu1 %vm391_vm6, %v4103_v38  ;;  %v4145_v58 = vpop.f32.mrb[14].mxu0  ;;  %v1592_v38 = vld [vmem:[%s5774_s11 + $0x60] sm:$0xff] }
 0x626   :  { %4344 = vmatpush3.bf16.msra.mxu1 %v4341_v46  ;;  %4136 = vmatprep.mubr.msk.f32.mxu1 %vm391_vm6, %v1262_v55  ;;  %v1432_v60 = vpop.f32.mrb[15].mxu0  ;;  %v4367_v43 = vpack.c.bf16 %v1594_v41, %v1592_v38  ;;  %v1695_v46 = vld [vmem:[%s5776_s13] sm:$0xff]  ;;  %v1714_v55 = vld [vmem:[%s5776_s13 + $0x98] sm:$0xff] }
 0x627   :  { %4350 = vmatprep.subr.bf16.mxu1 %v4349_v56 }
 0x628   :  { %4368 = vmatpush1.bf16.msra.mxu0 %v4367_v43 }
 0x62d   :  { %4137 = vmatmul.mubr.msk.f32.vlgmr.msra.gmra.mrb[8].mxu1 %vm391_vm6, %v4131_v52  ;;  %v1713_v52 = vld [vmem:[%s5776_s13 + $0x90] sm:$0xff] }
 0x62e   :  { %4352 = vmatpush3.bf16.msra.mxu1 %v4349_v56  ;;  %4150 = vmatprep.mubr.msk.f32.mxu1 %vm391_vm6, %v1432_v60  ;;  %v4371_v56 = vpack.c.bf16 %v1696_v48, %v1695_v46  ;;  %v1697_v60 = vld [vmem:[%s5776_s13 + $0x10] sm:$0xff]  ;;  %v1708_v48 = vld [vmem:[%s5776_s13 + $0x68] sm:$0xff] }
 0x62f   :  { %4370 = vmatprep.subr.bf16.mxu1 %v4369_v47 }
 0x635   :  { %4151 = vmatmul.mubr.msk.f32.vlgmr.msra.gmra.mrb[8].mxu1 %vm391_vm6, %v4145_v58  ;;  %v4373_v58 = vpack.c.bf16 %v1714_v55, %v1713_v52  ;;  %v1726_v55 = vld [vmem:[%s5776_s13 + $0xf8] sm:$0xff] }
 0x636   :  { %4372 = vmatpush3.bf16.msra.mxu1 %v4371_v56 }
 0x637   :  { %4374 = vmatprep.subr.bf16.mxu1 %v4373_v58  ;;  %v1709_v58 = vld [vmem:[%s5776_s13 + $0x70] sm:$0xff] }
 0x708   :  { %v4152_v62 = vpop.f32.mrb[8].mxu1 }
 0x709   :  { %v1532_v63 = vadd.f32 %v4152_v62, %v3715_v61  ;;  %v1513_v0 = vpop.f32.mrb[9].mxu1  ;;  %v1715_v62 = vld [vmem:[%s5776_s13 + $0xa0] sm:$0xff] }
 0x70a   :  { %v1531_v1 = vadd.f32 %v3715_v61, %v1513_v0  ;;  %v1698_v61 = vld [vmem:[%s5776_s13 + $0x18] sm:$0xff] }
 0x70b   :  { %v1534_v2 = vadd.f32 %v1532_v63, %v4966_v51  ;;  %v1716_v63 = vld [vmem:[%s5776_s13 + $0xa8] sm:$0xff]  ;;  %v4375_v0 = vpack.c.bf16 %v1698_v61, %v1697_v60  ;;  %v1710_v60 = vld [vmem:[%s5776_s13 + $0x78] sm:$0xff] }
 0x70c   :  { %v1533_v3 = vadd.f32 %v1531_v1, %v4958_v49  ;;  %v4377_v1 = vpack.c.bf16 %v1716_v63, %v1715_v62  ;;  %v4399_v61 = vpack.c.bf16 %v1710_v60, %v1709_v58  ;;  %v1596_v62 = vld [vmem:[%s5775_s12] sm:$0x3]  ;;  %v3734_v58 = vld [vmem:[%s5770_s7 + $0xc8] sm:$0xff]  ;;  %v3736_v60 = vld [vmem:[%s5770_s7 + $0xd8] sm:$0xff] }
 0x70d   :  { %v1540_v5 = vsel %vm301_vm5, %v1534_v2, 0.0  ;;  %4376 = vmatpush3.bf16.msra.mxu1 %v4375_v0  ;;  %v1601_v63 = vrot.slane %v1596_v62, %v4970_v54  ;;  %v1605_v0 = vrot.slane %v1596_v62, %v4976_v57  ;;  %v3733_v62 = vld [vmem:[%s5770_s7 + $0xc0] sm:$0xff] }
 0x70e   :  { %1541 = vadd.xlane.f32.xlu0 %v1540_v5  ;;  %v1537_v4 = vsel %vm301_vm5, %v1533_v3, 0.0  ;;  %v1717_v5 = vld [vmem:[%s5776_s13 + $0xb0] sm:$0xff]  ;;  %4378 = vmatprep.subr.bf16.mxu1 %v4377_v1 }
 0x70f   :  { %1538 = vadd.xlane.f32.xlu1 %v1537_v4  ;;  %v1718_v4 = vld [vmem:[%s5776_s13 + $0xb8] sm:$0xff] }
 0x79b   :  { %v1542_v6 = vpop.xlane.xlu0 %1541 }
 0x79c   :  { %v1545_v7 = vmul.f32 0.015625, %v1542_v6  ;;  %v1539_v8 = vpop.xlane.xlu1 %1538 }
 0x79d   :  { %v1544_v9 = vmul.f32 0.015625, %v1539_v8  ;;  %v1701_v8 = vld [vmem:[%s5776_s13 + $0x30] sm:$0xff] }
 0x79e   :  { %v5144_v10 = vsub.f32 %v1534_v2, %v1545_v7  ;;  %v1699_v2 = vld [vmem:[%s5776_s13 + $0x20] sm:$0xff]  ;;  %v4381_v7 = vpack.c.bf16 %v1718_v4, %v1717_v5 }
 0x79f   :  { %v5146_v12 = vsub.f32 %v1533_v3, %v1544_v9  ;;  %v1700_v3 = vld [vmem:[%s5776_s13 + $0x28] sm:$0xff]  ;;  %v1702_v9 = vld [vmem:[%s5776_s13 + $0x38] sm:$0xff] }
 0x7a0   :  { %v1549_v49 = vmul.f32 %v5144_v10, %v5144_v10  ;;  %v4379_v6 = vpack.c.bf16 %v1700_v3, %v1699_v2 }
 0x7a1   :  { %v1548_v13 = vmul.f32 %v5146_v12, %v5146_v12 }
 0x7a2   :  { %v1553_v14 = vsel %vm301_vm5, %v1549_v49, 0.0  ;;  %4380 = vmatpush3.bf16.msra.mxu1 %v4379_v6  ;;  %v4383_v49 = vpack.c.bf16 %v1702_v9, %v1701_v8 }
 0x7a3   :  { %v1550_v51 = vsel %vm301_vm5, %v1548_v13, 0.0  ;;  %v1719_v13 = vld [vmem:[%s5776_s13 + $0xc0] sm:$0xff]  ;;  %4382 = vmatprep.subr.bf16.mxu1 %v4381_v7 }
 0x7a4   :  { %1551 = vadd.xlane.f32.xlu1 %v1550_v51  ;;  %v1720_v51 = vld [vmem:[%s5776_s13 + $0xc8] sm:$0xff] }
 0x7a6   :  { %4384 = vmatpush3.bf16.msra.mxu1 %v4383_v49 }
 0x7a8   :  { %1554 = vadd.xlane.f32.xlu1 %v1553_v14  ;;  %v4385_v14 = vpack.c.bf16 %v1720_v51, %v1719_v13 }
 0x7aa   :  { %4386 = vmatprep.subr.bf16.mxu1 %v4385_v14 }
 0x7ab   :  { %4388 = vmatpush3.bf16.msra.mxu1 %v4387_v19 }
 0x7ac   :  { %4390 = vmatprep.subr.bf16.mxu1 %v4389_v20 }
 0x7af   :  { %4392 = vmatpush3.bf16.msra.mxu1 %v4391_v25 }
 0x7b0   :  { %4394 = vmatprep.subr.bf16.mxu1 %v4393_v26 }
 0x831   :  { %v1552_v27 = vpop.xlane.xlu1 %1551 }
 0x832   :  { %v1556_v28 = vmul.f32 0.015625, %v1552_v27 }
 0x834   :  { %v1558_v31 = vadd.f32 1e-05, %v1556_v28 }
 0x835   :  { %v1555_v32 = vpop.xlane.xlu1 %1554 }
 0x836   :  { %4671 = vrsqrt.f32 %v1558_v31  ;;  %v1557_v33 = vmul.f32 0.015625, %v1555_v32 }
 0x838   :  { %v1559_v34 = vadd.f32 1e-05, %v1557_v33 }
 0x83a   :  { %4673 = vrsqrt.f32 %v1559_v34 }
 0x840   :  { %v4672_v35 = vpop.eup %4671 }
 0x841   :  { %v1562_v38 = vmul.f32 %v4672_v35, %v5146_v12  ;;  %v1707_v12 = vld [vmem:[%s5776_s13 + $0x60] sm:$0xff] }
 0x842   :  { %v4395_v52 = vpack.c.bf16 %v1708_v48, %v1707_v12  ;;  %v3730_v12 = vld [vmem:[%s5770_s7 + $0xa8] sm:$0xff]  ;;  %v3732_v48 = vld [vmem:[%s5770_s7 + $0xb8] sm:$0xff] }
 0x843   :  { %v1570_v41 = vmul.f32 %v3716_v36, %v1562_v38 }
 0x844   :  { %v4674_v43 = vpop.eup %4673  ;;  %4396 = vmatpush3.bf16.msra.mxu1 %v4395_v52  ;;  %v4405_v52 = vpack.c.bf16 %v3732_v48, %v3730_v12 }
 0x845   :  { %v1578_v44 = vadd.f32 %v3717_v39, %v1570_v41  ;;  %v1563_v45 = vmul.f32 %v4674_v43, %v5144_v10  ;;  %v1725_v10 = vld [vmem:[%s5776_s13 + $0xf0] sm:$0xff]  ;;  %v3726_v41 = vld [vmem:[%s5770_s7 + $0x88] sm:$0xff]  ;;  %v3728_v43 = vld [vmem:[%s5770_s7 + $0x98] sm:$0xff] }
 0x846   :  { %v4397_v56 = vpack.c.bf16 %v1726_v55, %v1725_v10  ;;  %v3729_v10 = vld [vmem:[%s5770_s7 + $0xa0] sm:$0xff]  ;;  %v3731_v55 = vld [vmem:[%s5770_s7 + $0xb0] sm:$0xff] }
 0x847   :  { %3718 = vmatmul.mubr.msk.f32.vlgmr.msra.gmra.mrb[16].mxu0 %vm301_vm5, %v1578_v44  ;;  %v1571_v46 = vmul.f32 %v3716_v36, %v1563_v45  ;;  %v3725_v45 = vld [vmem:[%s5770_s7 + $0x80] sm:$0xff] }
 0x848   :  { %1684 = vmatprep.mubr.f32.mxu0 %v4753_v42  ;;  %4398 = vmatprep.subr.bf16.mxu1 %v4397_v56  ;;  %v4407_v56 = vpack.c.bf16 %v3731_v55, %v3729_v10 }
 0x849   :  { %v1579_v47 = vadd.f32 %v3717_v39, %v1571_v46  ;;  %4400 = vmatpush3.bf16.msra.mxu1 %v4399_v61  ;;  %v3727_v46 = vld [vmem:[%s5770_s7 + $0x90] sm:$0xff]  ;;  %v4409_v61 = vpack.c.bf16 %v3736_v60, %v3734_v58 }
 0x84b   :  { %3719 = vmatmul.mubr.msk.f32.gmra.mrb[18].mxu0 %vm301_vm5, %v1579_v47 }
 0x84c   :  { %1957 = vmatprep.mubr.f32.mxu0 %v4753_v42 }
 0x91a   :  { %v1680_v1 = vpop.f32.mrb[16].mxu0 }
 0x91b   :  { %v1681_v2 = vadd.f32 %v1680_v1, %v1601_v63  ;;  %v1682_v3 = vpop.f32.mrb[17].mxu0  ;;  %v3738_v1 = vld [vmem:[%s5770_s7 + $0xe8] sm:$0xff] }
 0x91c   :  { %v1683_v5 = vadd.f32 %v1682_v3, %v1605_v0 }
 0x91d   :  { %v1691_v7 = vmax.f32 %v1681_v2, 0.0  ;;  %v3740_v2 = vld [vmem:[%s5770_s7 + $0xf8] sm:$0xff] }
 0x91e   :  { %v1692_v4 = vmax.f32 %v1683_v5, 0.0  ;;  %v1686_v6 = vpop.f32.mrb[18].mxu0  ;;  %v4413_v3 = vpack.c.bf16 %v3740_v2, %v3738_v1  ;;  %v3737_v5 = vld [vmem:[%s5770_s7 + $0xe0] sm:$0xff] }
 0x91f   :  { %v1687_v8 = vadd.f32 %v1686_v6, %v1601_v63  ;;  %v1688_v9 = vpop.f32.mrb[19].mxu0  ;;  %v3735_v63 = vld [vmem:[%s5770_s7 + $0xd0] sm:$0xff] }
 0x920   :  { %v1689_v13 = vadd.f32 %v1688_v9, %v1605_v0  ;;  %1798 = vmatprep.mubr.f32.mxu1 %v1692_v4  ;;  %v4411_v0 = vpack.c.bf16 %v3735_v63, %v3733_v62  ;;  %v3739_v4 = vld [vmem:[%s5770_s7 + $0xf0] sm:$0xff] }
 0x921   :  { %1799 = vmatmul.mubr.f32.vlgmr.msra.gmra.mrb[10].mxu1 %v1691_v7  ;;  %v1693_v49 = vmax.f32 %v1687_v8, 0.0  ;;  %v4415_v6 = vpack.c.bf16 %v3739_v4, %v3737_v5 }
 0x922   :  { %v1694_v51 = vmax.f32 %v1689_v13, 0.0 }
 0x924   :  { %1803 = vmatprep.mubr.f32.mxu1 %v1694_v51 }
 0x925   :  { %1804 = vmatmul.mubr.f32.gmra.mrb[12].mxu1 %v1693_v49 }
 0x9f4   :  { %v3943_v14 = vpop.f32.mrb[10].mxu1 }
 0x9f5   :  { %v3944_v16 = vpop.f32.mrb[11].mxu1 }
 0x9f6   :  { %v3945_v17 = vadd.f32 %v3944_v16, %v3943_v14 }
 0x9f8   :  { %v1801_v18 = vadd.f32 %v3945_v17, %v3720_v15  ;;  %v3946_v19 = vpop.f32.mrb[12].mxu1  ;;  %v3724_v17 = vld [vmem:[%s5779_s16 + $0x1] ss:$0 sm:$0xff] }
 0x9f9   :  { %v3947_v20 = vpop.f32.mrb[13].mxu1 }
 0x9fa   :  { %v3948_v21 = vadd.f32 %v3947_v20, %v3946_v19  ;;  %v1809_v22 = vadd.f32 %v1801_v18, %v1578_v44  ;;  %v4401_v44 = vpack.c.bf16 %v3728_v43, %v3726_v41 }
 0x9fc   :  { %v1806_v23 = vadd.f32 %v3948_v21, %v3720_v15  ;;  %v1815_v24 = vsel %vm301_vm5, %v1809_v22, 0.0  ;;  %4402 = vmatprep.subr.bf16.mxu0 %v4401_v44  ;;  %v3723_v15 = vld [vmem:[%s5778_s15 + $0x1] ss:$0 sm:$0xff] }
 0x9fd   :  { %1816 = vadd.xlane.f32.xlu0 %v1815_v24  ;;  %v3741_v24 = vld [vmem:[%s5771_s8 + $0x2] sm:$0x3]  ;;  %s5809_s8 = smov 16  }
 0x9fe   :  { %v1810_v25 = vadd.f32 %v1806_v23, %v1579_v47  ;;  %v4403_v47 = vpack.c.bf16 %v3727_v46, %v3725_v45 }
 0xa00   :  { %v1818_v26 = vsel %vm301_vm5, %v1810_v25, 0.0  ;;  %4404 = vmatpush1.bf16.msra.mxu0 %v4403_v47 }
 0xa01   :  { %1819 = vadd.xlane.f32.xlu1 %v1818_v26  ;;  %4406 = vmatprep.subr.bf16.mxu0 %v4405_v52 }
 0xa04   :  { %4408 = vmatpush1.bf16.msra.mxu0 %v4407_v56 }
 0xa05   :  { %4410 = vmatprep.subr.bf16.mxu0 %v4409_v61 }
 0xa08   :  { %4412 = vmatpush1.bf16.msra.mxu0 %v4411_v0 }
 0xa09   :  { %4414 = vmatprep.subr.bf16.mxu0 %v4413_v3 }
 0xa0c   :  { %4416 = vmatpush1.bf16.msra.mxu0 %v4415_v6 }
 0xa8a   :  { %v1817_v27 = vpop.xlane.xlu0 %1816 }
 0xa8b   :  { %v1821_v28 = vmul.f32 0.015625, %v1817_v27 }
 0xa8d   :  { %v1823_v31 = vsub.f32 %v1809_v22, %v1821_v28 }
 0xa8e   :  { %v1820_v32 = vpop.xlane.xlu1 %1819 }
 0xa8f   :  { %v1822_v33 = vmul.f32 0.015625, %v1820_v32  ;;  %v1825_v34 = vmul.f32 %v1823_v31, %v1823_v31 }
 0xa91   :  { %v1824_v35 = vsub.f32 %v1810_v25, %v1822_v33  ;;  %v1827_v36 = vsel %vm301_vm5, %v1825_v34, 0.0  ;;  %v1880_v25 = vrot.slane %v3741_v24, %v4970_v54 }
 0xa92   :  { %1828 = vadd.xlane.f32.xlu0 %v1827_v36 }
 0xa93   :  { %v1826_v38 = vmul.f32 %v1824_v35, %v1824_v35 }
 0xa95   :  { %v1830_v39 = vsel %vm301_vm5, %v1826_v38, 0.0 }
 0xa96   :  { %1831 = vadd.xlane.f32.xlu1 %v1830_v39 }
 0xb1f   :  { %v1829_v7 = vpop.xlane.xlu0 %1828 }
 0xb20   :  { %v1833_v8 = vmul.f32 0.015625, %v1829_v7 }
 0xb22   :  { %v1835_v9 = vadd.f32 1e-05, %v1833_v8 }
 0xb23   :  { %v1832_v13 = vpop.xlane.xlu1 %1831 }
 0xb24   :  { %4675 = vrsqrt.f32 %v1835_v9  ;;  %v1834_v51 = vmul.f32 0.015625, %v1832_v13 }
 0xb26   :  { %v1836_v49 = vadd.f32 1e-05, %v1834_v51 }
 0xb28   :  { %4677 = vrsqrt.f32 %v1836_v49 }
 0xb2e   :  { %v4676_v14 = vpop.eup %4675 }
 0xb2f   :  { %v1839_v16 = vmul.f32 %v4676_v14, %v1823_v31  ;;  %v1884_v31 = vrot.slane %v3741_v24, %v4976_v57 }
 0xb31   :  { %v1847_v18 = vmul.f32 %v3723_v15, %v1839_v16 }
 0xb32   :  { %v4678_v19 = vpop.eup %4677 }
 0xb33   :  { %v5376_v20 = vadd.f32 %v3724_v17, %v1847_v18  ;;  %v1840_v21 = vmul.f32 %v4678_v19, %v1824_v35 }
 0xb35   :  { %3742 = vmatmul.mubr.msk.f32.vlgmr.msra.gmra.mrb[20].mxu0 %vm301_vm5, %v5376_v20  ;;  %v1848_v22 = vmul.f32 %v3723_v15, %v1840_v21 }
 0xb36   :  { %1963 = vmatprep.mubr.f32.mxu0 %v4753_v42 }
 0xb37   :  { %v5381_v23 = vadd.f32 %v3724_v17, %v1848_v22 }
 0xb39   :  { %3743 = vmatmul.mubr.msk.f32.gmra.mrb[22].mxu0 %vm301_vm5, %v5381_v23 }
 0xc08   :  { %v1959_v26 = vpop.f32.mrb[20].mxu0 }
 0xc09   :  { %v1960_v27 = vadd.f32 %v1959_v26, %v1880_v25  ;;  %v1961_v28 = vpop.f32.mrb[21].mxu0 }
 0xc0a   :  { %v1962_v35 = vadd.f32 %v1961_v28, %v1884_v31 }
 0xc0b   :  { %4157 = vmatprep.mubr.msk.f32.mxu0 %vm391_vm6, %v1960_v27 }
 0xc0c   :  { %v1965_v32 = vpop.f32.mrb[22].mxu0 }
 0xc0d   :  { %v1966_v33 = vadd.f32 %v1965_v32, %v1880_v25  ;;  %v1967_v34 = vpop.f32.mrb[23].mxu0 }
 0xc0e   :  { %v1968_v36 = vadd.f32 %v1967_v34, %v1884_v31 }
 0xc0f   :  { %v4609_v38 = vpack.i.bf16 %v1966_v33, %v1960_v27 }
 0xc10   :  { %v4441_v39 = vpack.c.bf16 %v1968_v36, %v1962_v35  ;;  %v5391_v41 = vpack.i.bf16 %v1968_v36, %v1962_v35 }
 0xc11   :  { %4610 = vrot.lane.b32.xlu1 %v4609_v38, %s4757_s28  ;;  %4605 = vrot.lane.b32.xlu0 %v4609_v38, %s4755_s27 }
 0xc15   :  { %2059 = vrot.lane.b32.xlu1 %v1960_v27, %s4754_s26  ;;  %2061 = vrot.lane.b32.xlu0 %v1966_v33, %s4754_s26 }
 0xc19   :  { %4615 = vrot.lane.b32.xlu1 %v4609_v38, %s4759_s0  ;;  %4620 = vrot.lane.b32.xlu0 %v4609_v38, %s5809_s8 }
 0xc1d   :  { %2150 = vrot.lane.b32.xlu1 %v1960_v27, %s5810_s1  ;;  %2152 = vrot.lane.b32.xlu0 %v1966_v33, %s5810_s1 }
 0xc21   :  { %2241 = vrot.lane.b32.xlu1 %v1960_v27, %s5811_s24  ;;  %2243 = vrot.lane.b32.xlu0 %v1966_v33, %s5811_s24 }
 0xc83   :  { %v4611_v43 = vpop.permute.xlu1 %4610  ;;  %v4606_v44 = vpop.permute.xlu0 %4605 }
 0xc84   :  { %v4613_v45 = vunpack.i.h.bf16 %v4611_v43  ;;  %v4612_v46 = vunpack.i.l.bf16 %v4611_v43  ;;  %v4608_v47 = vunpack.i.h.bf16 %v4606_v44  ;;  %v4607_v12 = vunpack.i.l.bf16 %v4606_v44 }
 0xc86   :  { %v4423_v48 = vpack.c.bf16 %v4613_v45, %v4612_v46  ;;  %v4417_v52 = vpack.c.bf16 %v4608_v47, %v4607_v12 }
 0xc87   :  { %v2060_v10 = vpop.permute.xlu1 %2059  ;;  %v2062_v55 = vpop.permute.xlu0 %2061 }
 0xc88   :  { %4419 = vmatprep.subr.msk.bf16.mxu0 %vm4994_vm7, %v4417_v52  ;;  %4425 = vmatprep.subr.msk.bf16.mxu1 %vm4994_vm7, %v4423_v48 }
 0xc89   :  { %4164 = vmatprep.mubr.msk.f32.mxu1 %vm391_vm6, %v2060_v10  ;;  %4422 = vmatpush3.bf16.xpose.msk.msra.mxu0 %vm4994_vm7, %v4417_v52 }
 0xc8a   :  { %4428 = vmatpush3.bf16.xpose.msk.msra.mxu1 %vm4994_vm7, %v4423_v48 }
 0xc8b   :  { %v4616_v56 = vpop.permute.xlu1 %4615  ;;  %v4621_v58 = vpop.permute.xlu0 %4620 }
 0xc8c   :  { %v4618_v60 = vunpack.i.h.bf16 %v4616_v56  ;;  %v4617_v61 = vunpack.i.l.bf16 %v4616_v56  ;;  %v4623_v62 = vunpack.i.h.bf16 %v4621_v58  ;;  %v4622_v63 = vunpack.i.l.bf16 %v4621_v58 }
 0xc8e   :  { %v4429_v0 = vpack.c.bf16 %v4618_v60, %v4617_v61  ;;  %v4435_v1 = vpack.c.bf16 %v4623_v62, %v4622_v63 }
 0xc8f   :  { %v2151_v2 = vpop.permute.xlu1 %2150  ;;  %v2153_v3 = vpop.permute.xlu0 %2152 }
 0xc90   :  { %4158 = vmatmul.mubr.msk.f32.vlgmr.msra.gmra.mrb[24].mxu0 %vm391_vm6, %v1966_v33  ;;  %4431 = vmatprep.subr.msk.bf16.mxu0 %vm4994_vm7, %v4429_v0 }
 0xc91   :  { %4165 = vmatmul.mubr.msk.f32.vlgmr.msra.gmra.mrb[14].mxu1 %vm391_vm6, %v2062_v55  ;;  %4437 = vmatprep.subr.msk.bf16.mxu1 %vm4994_vm7, %v4435_v1 }
 0xc92   :  { %4434 = vmatpush3.bf16.xpose.msk.msra.mxu0 %vm4994_vm7, %v4429_v0  ;;  %4171 = vmatprep.mubr.msk.f32.mxu0 %vm391_vm6, %v2151_v2 }
 0xc93   :  { %4440 = vmatpush3.bf16.xpose.msk.msra.mxu1 %vm4994_vm7, %v4435_v1  ;;  %4442 = vmatprep.subr.bf16.mxu0 %v4441_v39  ;;  %v2242_v5 = vpop.permute.xlu1 %2241  ;;  %v2244_v4 = vpop.permute.xlu0 %2243 }
 0xc94   :  { %4178 = vmatprep.mubr.msk.f32.mxu1 %vm391_vm6, %v2242_v5 }
 0xc99   :  { %4172 = vmatmul.mubr.msk.f32.vlgmr.msra.gmra.mrb[26].mxu0 %vm391_vm6, %v2153_v3 }
 0xc9a   :  { %4179 = vmatmul.mubr.msk.f32.vlgmr.msra.gmra.mrb[16].mxu1 %vm391_vm6, %v2244_v4  ;;  %4444 = vmatpush3.bf16.msra.mxu0 %v4441_v39 }
 0xd63   :  { %v4159_v6 = vpop.f32.mrb[24].mxu0 }
 0xd64   :  { %v2333_v7 = vadd.f32 %v4159_v6, %v5024_v29  ;;  %v4166_v8 = vpop.f32.mrb[14].mxu1  ;;  %v2050_v9 = vpop.f32.mrb[25].mxu0 }
 0xd65   :  { %v2332_v13 = vadd.f32 %v2050_v9, %v5029_v30  ;;  %v2141_v51 = vpop.f32.mrb[15].mxu1  ;;  %v2335_v14 = vadd.f32 %v4166_v8, %v5046_v40  ;;  %v4727_v40 = vld [vmem:[%s5808_s23 + $0x20] sm:$0xff] }
 0xd66   :  { %v2334_v11 = vadd.f32 %v2141_v51, %v5038_v37  ;;  %v2343_v49 = vsel %vm391_vm6, %v2333_v7, -inf }
 0xd67   :  { %2344 = vmax.xlane.f32.xlu0 %v2343_v49  ;;  %v2340_v15 = vsel %vm391_vm6, %v2332_v13, -inf  ;;  %v2349_v29 = vsel %vm391_vm6, %v2335_v14, -inf }
 0xd68   :  { %2341 = vmax.xlane.f32.xlu1 %v2340_v15  ;;  %v2346_v16 = vsel %vm391_vm6, %v2334_v11, -inf }
 0xd6b   :  { %2347 = vmax.xlane.f32.xlu0 %v2346_v16 }
 0xd6c   :  { %v4173_v17 = vpop.f32.mrb[26].mxu0  ;;  %2350 = vmax.xlane.f32.xlu1 %v2349_v29 }
 0xd6d   :  { %v4180_v18 = vpop.f32.mrb[16].mxu1  ;;  %v2337_v30 = vadd.f32 %v4173_v17, %v5054_v50  ;;  %v2232_v19 = vpop.f32.mrb[27].mxu0 }
 0xd6e   :  { %v2323_v37 = vpop.f32.mrb[17].mxu1  ;;  %v5438_v21 = vadd.f32 %v4727_v40, %v2232_v19  ;;  %v2339_v22 = vadd.f32 %v4180_v18, %v5067_v59 }
 0xd6f   :  { %v2355_v24 = vsel %vm391_vm6, %v2337_v30, -inf  ;;  %v2338_v25 = vadd.f32 %v2323_v37, %v5060_v53 }
 0xd70   :  { %2356 = vmax.xlane.f32.xlu1 %v2355_v24  ;;  %v2352_v26 = vsel %vm391_vm6, %v5438_v21, -inf  ;;  %v2361_v50 = vsel %vm391_vm6, %v2339_v22, -inf }
 0xd71   :  { %2353 = vmax.xlane.f32.xlu0 %v2352_v26  ;;  %v2358_v27 = vsel %vm391_vm6, %v2338_v25, -inf }
 0xd74   :  { %2362 = vmax.xlane.f32.xlu1 %v2361_v50 }
 0xd75   :  { %2359 = vmax.xlane.f32.xlu0 %v2358_v27 }
 0xdf4   :  { %v2345_v28 = vpop.xlane.xlu0 %2344 }
 0xdf5   :  { %v2365_v31 = vsub.f32 %v2333_v7, %v2345_v28  ;;  %v2342_v32 = vpop.xlane.xlu1 %2341 }
 0xdf6   :  { %v2364_v33 = vsub.f32 %v2332_v13, %v2342_v32 }
 0xdf7   :  { %v2374_v59 = vmul.f32 1.442695, %v2365_v31 }
 0xdf8   :  { %v2372_v34 = vmul.f32 1.442695, %v2364_v33  ;;  %v2348_v35 = vpop.xlane.xlu0 %2347 }
 0xdf9   :  { %4679 = vpow2.f32 %v2374_v59  ;;  %v2366_v53 = vsub.f32 %v2334_v11, %v2348_v35  ;;  %v2351_v36 = vpop.xlane.xlu1 %2350 }
 0xdfa   :  { %4681 = vpow2.f32 %v2372_v34  ;;  %v2367_v38 = vsub.f32 %v2335_v14, %v2351_v36 }
 0xdfb   :  { %v2376_v39 = vmul.f32 1.442695, %v2366_v53 }
 0xdfc   :  { %v2378_v43 = vmul.f32 1.442695, %v2367_v38 }
 0xdfd   :  { %4683 = vpow2.f32 %v2376_v39  ;;  %v2357_v44 = vpop.xlane.xlu1 %2356 }
 0xdfe   :  { %4685 = vpow2.f32 %v2378_v43  ;;  %v2369_v45 = vsub.f32 %v2337_v30, %v2357_v44  ;;  %v2354_v46 = vpop.xlane.xlu0 %2353 }
 0xdff   :  { %v2368_v9 = vsub.f32 %v5438_v21, %v2354_v46 }
 0xe00   :  { %v2382_v47 = vmul.f32 1.442695, %v2369_v45 }
 0xe01   :  { %v2363_v12 = vpop.xlane.xlu1 %2362  ;;  %v2380_v13 = vmul.f32 1.442695, %v2368_v9 }
 0xe02   :  { %4687 = vpow2.f32 %v2382_v47  ;;  %v2371_v48 = vsub.f32 %v2339_v22, %v2363_v12  ;;  %v2360_v52 = vpop.xlane.xlu0 %2359 }
 0xe03   :  { %v4680_v10 = vpop.eup %4679  ;;  %v2370_v55 = vsub.f32 %v2338_v25, %v2360_v52  ;;  %v3763_v52 = vld [vmem:[%s5772_s9 + $0x58] sm:$0xff] }
 0xe04   :  { %v4682_v56 = vpop.eup %4681  ;;  %v2386_v58 = vmul.f32 1.442695, %v2371_v48  ;;  %v2391_v60 = vsel %vm391_vm6, %v4680_v10, 0.0  ;;  %v3762_v48 = vld [vmem:[%s5772_s9 + $0x50] sm:$0xff] }
 0xe05   :  { %v2384_v61 = vmul.f32 1.442695, %v2370_v55  ;;  %2392 = vadd.xlane.f32.xlu1 %v2391_v60  ;;  %v2388_v62 = vsel %vm391_vm6, %v4682_v56, 0.0  ;;  %v3760_v55 = vld [vmem:[%s5772_s9 + $0x40] sm:$0xff] }
 0xe06   :  { %4689 = vpow2.f32 %v2386_v58  ;;  %2389 = vadd.xlane.f32.xlu0 %v2388_v62  ;;  %v3764_v62 = vld [vmem:[%s5772_s9 + $0x60] sm:$0xff] }
 0xe07   :  { %v4684_v63 = vpop.eup %4683  ;;  %4691 = vpow2.f32 %v2384_v61 }
 0xe08   :  { %v4686_v0 = vpop.eup %4685  ;;  %v2394_v1 = vsel %vm391_vm6, %v4684_v63, 0.0  ;;  %4693 = vpow2.f32 %v2380_v13  ;;  %v3785_v13 = vld [vmem:[%s5773_s10 + $0x1] ss:$0 sm:$0xff] }
 0xe09   :  { %v2397_v2 = vsel %vm391_vm6, %v4686_v0, 0.0 }
 0xe0a   :  { %2398 = vadd.xlane.f32.xlu1 %v2397_v2  ;;  %2395 = vadd.xlane.f32.xlu0 %v2394_v1 }
 0xe0c   :  { %v5451_v3 = vpop.eup %4687 }
 0xe0d   :  { %v2403_v5 = vsel %vm391_vm6, %v5451_v3, 0.0 }
 0xe0e   :  { %2404 = vadd.xlane.f32.xlu1 %v2403_v5  ;;  %v3767_v5 = vld [vmem:[%s5772_s9 + $0x78] sm:$0xff] }
 0xe10   :  { %v5455_v4 = vpop.eup %4689 }
 0xe11   :  { %v2409_v6 = vsel %vm391_vm6, %v5455_v4, 0.0  ;;  %v5459_v7 = vpop.eup %4691 }
 0xe12   :  { %2410 = vadd.xlane.f32.xlu1 %v2409_v6  ;;  %v2406_v8 = vsel %vm391_vm6, %v5459_v7, 0.0  ;;  %v4694_v51 = vpop.eup %4693 }
 0xe13   :  { %v2400_v11 = vsel %vm391_vm6, %v4694_v51, 0.0 }
 0xe16   :  { %2407 = vadd.xlane.f32.xlu1 %v2406_v8 }
 0xe20   :  { %4625 = vrot.lane.b32.xlu0 %v5391_v41, %s4754_s26 }
 0xe27   :  { %4630 = vrot.lane.b32.xlu1 %v5391_v41, %s5810_s1 }
 0xe3f   :  { %2401 = vadd.xlane.f32.xlu0 %v2400_v11 }
 0xe55   :  { %4635 = vrot.lane.b32.xlu0 %v5391_v41, %s5811_s24 }
 0xe92   :  { %v2393_v49 = vpop.xlane.xlu1 %2392 }
 0xe93   :  { %4695 = vrcp.f32 %v2393_v49  ;;  %v2390_v14 = vpop.xlane.xlu0 %2389 }
 0xe94   :  { %4697 = vrcp.f32 %v2390_v14 }
 0xe97   :  { %v2399_v15 = vpop.xlane.xlu1 %2398  ;;  %v2396_v16 = vpop.xlane.xlu0 %2395 }
 0xe98   :  { %4699 = vrcp.f32 %v2399_v15 }
 0xe99   :  { %4701 = vrcp.f32 %v2396_v16 }
 0xe9b   :  { %v2405_v29 = vpop.xlane.xlu1 %2404  ;;  %v4626_v17 = vpop.permute.xlu0 %4625 }
 0xe9c   :  { %v4628_v18 = vunpack.i.h.bf16 %v4626_v17  ;;  %v4627_v30 = vunpack.i.l.bf16 %v4626_v17  ;;  %4703 = vrcp.f32 %v2405_v29 }
 0xe9d   :  { %v4696_v19 = vpop.eup %4695 }
 0xe9e   :  { %v4698_v37 = vpop.eup %4697  ;;  %v4445_v40 = vpack.c.bf16 %v4628_v18, %v4627_v30  ;;  %v2421_v24 = vmul.f32 %v4696_v19, %v4680_v10  ;;  %v4449_v10 = vpack.c.bf16 %v3763_v52, %v3762_v48  ;;  %v3804_v48 = vld [vmem:[%s5774_s11 + $0xf0] sm:$0xff] }
 0xe9f   :  { %v2411_v21 = vpop.xlane.xlu1 %2410  ;;  %v2420_v22 = vmul.f32 %v4698_v37, %v4682_v56  ;;  %v3761_v56 = vld [vmem:[%s5772_s9 + $0x48] sm:$0xff] }
 0xea0   :  { %4446 = vmatprep.subr.bf16.mxu0 %v4445_v40  ;;  %4450 = vmatprep.subr.bf16.mxu1 %v4449_v10  ;;  %v4453_v58 = vpack.c.bf16 %v3761_v56, %v3760_v55  ;;  %v3826_v55 = vld [vmem:[%s5776_s13 + $0x188] sm:$0xff]  ;;  %v3809_v56 = vld [vmem:[%s5776_s13 + $0x100] sm:$0xff] }
 0xea1   :  { %4185 = vmatprep.mubr.msk.f32.mxu0 %vm391_vm6, %v2420_v22  ;;  %4452 = vmatpush3.bf16.msra.mxu1 %v4449_v10  ;;  %v3825_v10 = vld [vmem:[%s5776_s13 + $0x180] sm:$0xff] }
 0xea2   :  { %v4700_v41 = vpop.eup %4699  ;;  %4186 = vmatmul.mubr.msk.f32.vlgmr.msra.gmra.mrb[28].mxu0 %vm391_vm6, %v2421_v24  ;;  %4454 = vmatprep.subr.bf16.mxu1 %v4453_v58 }
 0xea3   :  { %v4702_v25 = vpop.eup %4701  ;;  %v2423_v26 = vmul.f32 %v4700_v41, %v4686_v0  ;;  %4448 = vmatpush3.bf16.msra.mxu0 %v4445_v40  ;;  %v2408_v50 = vpop.xlane.xlu1 %2407  ;;  %v3791_v41 = vld [vmem:[%s5774_s11 + $0x88] sm:$0xff] }
 0xea4   :  { %v2422_v27 = vmul.f32 %v4702_v25, %v4684_v63  ;;  %4705 = vrcp.f32 %v2408_v50  ;;  %v3765_v63 = vld [vmem:[%s5772_s9 + $0x68] sm:$0xff]  ;;  %v3793_v25 = vld [vmem:[%s5774_s11 + $0x98] sm:$0xff]  ;;  %v3790_v50 = vld [vmem:[%s5774_s11 + $0x80] sm:$0xff] }
 0xea5   :  { %v4461_v2 = vpack.c.bf16 %v3765_v63, %v3764_v62  ;;  %v3828_v62 = vld [vmem:[%s5776_s13 + $0x198] sm:$0xff] }
 0xea6   :  { %4192 = vmatprep.mubr.msk.f32.mxu0 %vm391_vm6, %v2422_v27  ;;  %v4704_v38 = vpop.eup %4703  ;;  %v3792_v27 = vld [vmem:[%s5774_s11 + $0x90] sm:$0xff] }
 0xea7   :  { %4193 = vmatmul.mubr.msk.f32.vlgmr.msra.gmra.mrb[30].mxu0 %vm391_vm6, %v2423_v26  ;;  %v4631_v28 = vpop.permute.xlu1 %4630  ;;  %v2425_v45 = vmul.f32 %v4704_v38, %v5451_v3  ;;  %v3766_v3 = vld [vmem:[%s5772_s9 + $0x70] sm:$0xff]  ;;  %v4473_v26 = vpack.c.bf16 %v3793_v25, %v3791_v41  ;;  %v3837_v41 = vld [vmem:[%s5776_s13 + $0x1e0] sm:$0xff]  ;;  %v3838_v25 = vld [vmem:[%s5776_s13 + $0x1e8] sm:$0xff] }
 0xea8   :  { %v4633_v31 = vunpack.i.h.bf16 %v4631_v28  ;;  %v4632_v32 = vunpack.i.l.bf16 %v4631_v28  ;;  %v4475_v28 = vpack.c.bf16 %v3792_v27, %v3790_v50  ;;  %v4513_v50 = vpack.c.bf16 %v3838_v25, %v3837_v41 }
 0xeaa   :  { %v4457_v33 = vpack.c.bf16 %v4633_v31, %v4632_v32  ;;  %v3795_v31 = vld [vmem:[%s5774_s11 + $0xa8] sm:$0xff]  ;;  %v3797_v32 = vld [vmem:[%s5774_s11 + $0xb8] sm:$0xff] }
 0xeac   :  { %4458 = vmatprep.subr.bf16.mxu0 %v4457_v33 }
 0xead   :  { %4460 = vmatpush3.bf16.msra.mxu0 %v4457_v33  ;;  %v4477_v33 = vpack.c.bf16 %v3797_v32, %v3795_v31 }
 0xeae   :  { %v4706_v39 = vpop.eup %4705 }
 0xeaf   :  { %v2426_v47 = vmul.f32 %v4706_v39, %v5459_v7  ;;  %v3798_v39 = vld [vmem:[%s5774_s11 + $0xc0] sm:$0xff] }
 0xecc   :  { %v2402_v59 = vpop.xlane.xlu0 %2401 }
 0xecd   :  { %4707 = vrcp.f32 %v2402_v59  ;;  %v3794_v59 = vld [vmem:[%s5774_s11 + $0xa0] sm:$0xff] }
 0xece   :  { %4709 = vrcp.f32 %v2411_v21 }
 0xed0   :  { %v4636_v34 = vpop.permute.xlu0 %4635 }
 0xed1   :  { %v4638_v35 = vunpack.i.h.bf16 %v4636_v34  ;;  %v4637_v53 = vunpack.i.l.bf16 %v4636_v34  ;;  %v3796_v34 = vld [vmem:[%s5774_s11 + $0xb0] sm:$0xff] }
 0xed3   :  { %v4465_v36 = vpack.c.bf16 %v4638_v35, %v4637_v53  ;;  %v4479_v35 = vpack.c.bf16 %v3796_v34, %v3794_v59  ;;  %v3799_v53 = vld [vmem:[%s5774_s11 + $0xc8] sm:$0xff] }
 0xed5   :  { %4466 = vmatprep.subr.bf16.mxu0 %v4465_v36 }
 0xed7   :  { %v4708_v43 = vpop.eup %4707 }
 0xed8   :  { %v2424_v44 = vmul.f32 %v4708_v43, %v4694_v51  ;;  %v4710_v46 = vpop.eup %4709  ;;  %v3800_v43 = vld [vmem:[%s5774_s11 + $0xd0] sm:$0xff] }
 0xed9   :  { %v2427_v12 = vmul.f32 %v4710_v46, %v5455_v4  ;;  %v4469_v4 = vpack.c.bf16 %v3767_v5, %v3766_v3  ;;  %v3805_v46 = vld [vmem:[%s5774_s11 + $0xf8] sm:$0xff]  ;;  %v3829_v3 = vld [vmem:[%s5776_s13 + $0x1a0] sm:$0xff]  ;;  %v3830_v5 = vld [vmem:[%s5776_s13 + $0x1a8] sm:$0xff] }
 0xeda   :  { %4213 = vmatprep.mubr.msk.f32.mxu0 %vm391_vm6, %v2424_v44  ;;  %v4483_v44 = vpack.c.bf16 %v3800_v43, %v3798_v39 }
 0xedb   :  { %4214 = vmatmul.mubr.msk.f32.vlgmr.msra.gmra.mrb[32].mxu0 %vm391_vm6, %v2425_v45  ;;  %v3803_v45 = vld [vmem:[%s5774_s11 + $0xe8] sm:$0xff] }
 0xedc   :  { %4468 = vmatpush3.bf16.msra.mxu0 %v4465_v36  ;;  %4227 = vmatprep.mubr.msk.f32.mxu0 %vm391_vm6, %v2426_v47  ;;  %v3801_v36 = vld [vmem:[%s5774_s11 + $0xd8] sm:$0xff]  ;;  %v3802_v47 = vld [vmem:[%s5774_s11 + $0xe0] sm:$0xff] }
 0xedd   :  { %4474 = vmatprep.subr.bf16.mxu0 %v4473_v26  ;;  %v4481_v38 = vpack.c.bf16 %v3801_v36, %v3799_v53  ;;  %v4487_v52 = vpack.c.bf16 %v3804_v48, %v3802_v47  ;;  %v3789_v36 = vld [vmem:[%s5779_s16 + $0x2] ss:$0 sm:$0xff]  ;;  %v3822_v47 = vld [vmem:[%s5776_s13 + $0x168] sm:$0xff] }
 0xedf   :  { %4228 = vmatmul.mubr.msk.f32.vlgmr.msra.gmra.mrb[34].mxu0 %vm391_vm6, %v2427_v12  ;;  %v4485_v12 = vpack.c.bf16 %v3805_v46, %v3803_v45 }
 0xee0   :  { %3267 = vmatprep.mubr.f32.mxu0 %v4753_v42  ;;  %4476 = vmatpush1.bf16.msra.mxu0 %v4475_v28 }
 0xee1   :  { %4478 = vmatprep.subr.bf16.mxu0 %v4477_v33 }
 0xee4   :  { %4480 = vmatpush1.bf16.msra.mxu0 %v4479_v35  ;;  %v3788_v35 = vld [vmem:[%s5778_s15 + $0x2] ss:$0 sm:$0xff] }
 0xee5   :  { %4482 = vmatprep.subr.bf16.mxu0 %v4481_v38 }
 0xee8   :  { %4484 = vmatpush1.bf16.msra.mxu0 %v4483_v44 }
 0xee9   :  { %4486 = vmatprep.subr.bf16.mxu0 %v4485_v12 }
 0xeec   :  { %4488 = vmatpush1.bf16.msra.mxu0 %v4487_v52  ;;  %v3823_v52 = vld [vmem:[%s5776_s13 + $0x170] sm:$0xff] }
 0xf75   :  { %v4187_v60 = vpop.f32.mrb[28].mxu0 }
 0xf76   :  { %v2509_v61 = vpop.f32.mrb[29].mxu0 }
 0xf7a   :  { %v4194_v0 = vpop.f32.mrb[30].mxu0 }
 0xf7b   :  { %v2598_v1 = vpop.f32.mrb[31].mxu0 }
 0xf7c   :  { %4199 = vmatprep.mubr.msk.f32.mxu1 %vm391_vm6, %v2598_v1  ;;  %v3811_v1 = vld [vmem:[%s5776_s13 + $0x110] sm:$0xff] }
 0xf7d   :  { %4200 = vmatmul.mubr.msk.f32.vlgmr.msra.gmra.mrb[18].mxu1 %vm391_vm6, %v4194_v0 }
 0xf7e   :  { %4206 = vmatprep.mubr.msk.f32.mxu1 %vm391_vm6, %v2509_v61  ;;  %4456 = vmatpush3.bf16.msra.mxu1 %v4453_v58  ;;  %v4489_v58 = vpack.c.bf16 %v3826_v55, %v3825_v10  ;;  %v3827_v61 = vld [vmem:[%s5776_s13 + $0x190] sm:$0xff]  ;;  %v3824_v10 = vld [vmem:[%s5776_s13 + $0x178] sm:$0xff] }
 0xf7f   :  { %4462 = vmatprep.subr.bf16.mxu1 %v4461_v2  ;;  %v4493_v0 = vpack.c.bf16 %v3828_v62, %v3827_v61  ;;  %v4519_v55 = vpack.c.bf16 %v3824_v10, %v3823_v52  ;;  %v3846_v10 = vld [vmem:[%s5779_s16 + $0x3] ss:$0 sm:$0xff] }
 0xf85   :  { %4207 = vmatmul.mubr.msk.f32.vlgmr.msra.gmra.mrb[18].mxu1 %vm391_vm6, %v4187_v60  ;;  %v3810_v60 = vld [vmem:[%s5776_s13 + $0x108] sm:$0xff] }
 0xf86   :  { %4464 = vmatpush3.bf16.msra.mxu1 %v4461_v2  ;;  %v4491_v63 = vpack.c.bf16 %v3810_v60, %v3809_v56  ;;  %v3812_v2 = vld [vmem:[%s5776_s13 + $0x118] sm:$0xff]  ;;  %v3806_v56 = vld [vmem:[%s5775_s12 + $0x2] sm:$0x3] }
 0xf87   :  { %4470 = vmatprep.subr.bf16.mxu1 %v4469_v4  ;;  %v3194_v60 = vrot.slane %v3806_v56, %v4976_v57 }
 0xfae   :  { %v4215_v6 = vpop.f32.mrb[32].mxu0 }
 0xfaf   :  { %v2847_v7 = vpop.f32.mrb[33].mxu0 }
 0xfb0   :  { %4220 = vmatprep.mubr.msk.f32.mxu1 %vm391_vm6, %v2847_v7  ;;  %v3813_v7 = vld [vmem:[%s5776_s13 + $0x120] sm:$0xff] }
 0xfb1   :  { %4221 = vmatmul.mubr.msk.f32.vlgmr.msra.gmra.mrb[18].mxu1 %vm391_vm6, %v4215_v6  ;;  %v4497_v6 = vpack.c.bf16 %v3830_v5, %v3829_v3 }
 0xfb2   :  { %v4229_v8 = vpop.f32.mrb[34].mxu0  ;;  %4472 = vmatpush3.bf16.msra.mxu1 %v4469_v4  ;;  %v4495_v4 = vpack.c.bf16 %v3812_v2, %v3811_v1 }
 0xfb3   :  { %v3017_v9 = vpop.f32.mrb[35].mxu0  ;;  %4490 = vmatprep.subr.bf16.mxu1 %v4489_v58  ;;  %v3190_v58 = vrot.slane %v3806_v56, %v4970_v54  ;;  %v3842_v54 = vld [vmem:[%s5777_s14 + $0x1] ss:$0 sm:$0xff] }
 0xfb4   :  { %4234 = vmatprep.mubr.msk.f32.mxu1 %vm391_vm6, %v3017_v9  ;;  %v3831_v9 = vld [vmem:[%s5776_s13 + $0x1b0] sm:$0xff] }
 0xfb9   :  { %4235 = vmatmul.mubr.msk.f32.vlgmr.msra.gmra.mrb[18].mxu1 %vm391_vm6, %v4229_v8  ;;  %v3814_v8 = vld [vmem:[%s5776_s13 + $0x128] sm:$0xff] }
 0xfba   :  { %4492 = vmatpush3.bf16.msra.mxu1 %v4491_v63 }
 0xfbb   :  { %4494 = vmatprep.subr.bf16.mxu1 %v4493_v0 }
 0xfbe   :  { %4496 = vmatpush3.bf16.msra.mxu1 %v4495_v4 }
 0xfbf   :  { %4498 = vmatprep.subr.bf16.mxu1 %v4497_v6 }
0x108c   :  { %v4236_v51 = vpop.f32.mrb[18].mxu1 }
0x108d   :  { %v3118_v11 = vadd.f32 %v4236_v51, %v3785_v13  ;;  %v3098_v49 = vpop.f32.mrb[19].mxu1  ;;  %v4499_v51 = vpack.c.bf16 %v3814_v8, %v3813_v7 }
0x108e   :  { %v3117_v14 = vadd.f32 %v3785_v13, %v3098_v49  ;;  %v3832_v13 = vld [vmem:[%s5776_s13 + $0x1b8] sm:$0xff]  ;;  %v3815_v49 = vld [vmem:[%s5776_s13 + $0x130] sm:$0xff] }
0x108f   :  { %v3120_v15 = vadd.f32 %v3118_v11, %v5381_v23  ;;  %v4501_v11 = vpack.c.bf16 %v3832_v13, %v3831_v9  ;;  %4500 = vmatpush3.bf16.msra.mxu1 %v4499_v51 }
0x1090   :  { %v3119_v16 = vadd.f32 %v3117_v14, %v5376_v20  ;;  %v3816_v14 = vld [vmem:[%s5776_s13 + $0x138] sm:$0xff] }
0x1091   :  { %v3128_v29 = vsel %vm301_vm5, %v3120_v15, 0.0  ;;  %4502 = vmatprep.subr.bf16.mxu1 %v4501_v11 }
0x1092   :  { %3129 = vadd.xlane.f32.xlu1 %v3128_v29  ;;  %v3125_v17 = vsel %vm301_vm5, %v3119_v16, 0.0  ;;  %v4503_v29 = vpack.c.bf16 %v3816_v14, %v3815_v49 }
0x1093   :  { %3126 = vadd.xlane.f32.xlu0 %v3125_v17 }
0x1094   :  { %4504 = vmatpush3.bf16.msra.mxu1 %v4503_v29 }
0x111f   :  { %v3130_v18 = vpop.xlane.xlu1 %3129 }
0x1120   :  { %v3132_v30 = vmul.f32 0.015625, %v3130_v18  ;;  %v3127_v19 = vpop.xlane.xlu0 %3126  ;;  %v3817_v18 = vld [vmem:[%s5776_s13 + $0x140] sm:$0xff] }
0x1121   :  { %v3131_v37 = vmul.f32 0.015625, %v3127_v19  ;;  %v3835_v19 = vld [vmem:[%s5776_s13 + $0x1d0] sm:$0xff] }
0x1122   :  { %v5522_v40 = vsub.f32 %v3120_v15, %v3132_v30  ;;  %v3833_v15 = vld [vmem:[%s5776_s13 + $0x1c0] sm:$0xff]  ;;  %v3818_v30 = vld [vmem:[%s5776_s13 + $0x148] sm:$0xff] }
0x1123   :  { %v5524_v21 = vsub.f32 %v3119_v16, %v3131_v37  ;;  %v3834_v16 = vld [vmem:[%s5776_s13 + $0x1c8] sm:$0xff]  ;;  %v3836_v37 = vld [vmem:[%s5776_s13 + $0x1d8] sm:$0xff] }
0x1124   :  { %v3136_v20 = vmul.f32 %v5522_v40, %v5522_v40  ;;  %v4505_v17 = vpack.c.bf16 %v3834_v16, %v3833_v15 }
0x1125   :  { %v3135_v22 = vmul.f32 %v5524_v21, %v5524_v21 }
0x1126   :  { %v3140_v24 = vsel %vm301_vm5, %v3136_v20, 0.0  ;;  %4506 = vmatprep.subr.bf16.mxu1 %v4505_v17  ;;  %v3819_v20 = vld [vmem:[%s5776_s13 + $0x150] sm:$0xff] }
0x1127   :  { %v3137_v23 = vsel %vm301_vm5, %v3135_v22, 0.0  ;;  %v4507_v22 = vpack.c.bf16 %v3818_v30, %v3817_v18 }
0x1128   :  { %3138 = vadd.xlane.f32.xlu0 %v3137_v23  ;;  %v4509_v23 = vpack.c.bf16 %v3836_v37, %v3835_v19 }
0x1129   :  { %4508 = vmatpush3.bf16.msra.mxu1 %v4507_v22 }
0x112a   :  { %4510 = vmatprep.subr.bf16.mxu1 %v4509_v23 }
0x112c   :  { %3141 = vadd.xlane.f32.xlu0 %v3140_v24  ;;  %v3820_v24 = vld [vmem:[%s5776_s13 + $0x158] sm:$0xff] }
0x112d   :  { %v4511_v26 = vpack.c.bf16 %v3820_v24, %v3819_v20 }
0x112f   :  { %4512 = vmatpush3.bf16.msra.mxu1 %v4511_v26 }
0x1130   :  { %4514 = vmatprep.subr.bf16.mxu1 %v4513_v50  ;;  %v3448_v50 = vld [vmem:[%s5780_s17] sm:$0xff] }
0x11b5   :  { %v3139_v27 = vpop.xlane.xlu0 %3138 }
0x11b6   :  { %v3143_v28 = vmul.f32 0.015625, %v3139_v27  ;;  %v3449_v27 = vld [vmem:[%s5780_s17 + $0x8] sm:$0xff] }
0x11b8   :  { %v3145_v31 = vadd.f32 1e-05, %v3143_v28  ;;  %v4521_v28 = vpack.c.bf16 %v3449_v27, %v3448_v50 }
0x11b9   :  { %v3142_v32 = vpop.xlane.xlu0 %3141 }
0x11ba   :  { %4711 = vrsqrt.f32 %v3145_v31  ;;  %v3144_v33 = vmul.f32 0.015625, %v3142_v32  ;;  %4522 = vmatprep.subr.bf16.mxu0 %v4521_v28  ;;  %v3450_v31 = vld [vmem:[%s5780_s17 + $0x10] sm:$0xff]  ;;  %v3451_v32 = vld [vmem:[%s5780_s17 + $0x18] sm:$0xff] }
0x11bc   :  { %v3146_v59 = vadd.f32 1e-05, %v3144_v33  ;;  %v4525_v33 = vpack.c.bf16 %v3451_v32, %v3450_v31 }
0x11be   :  { %4713 = vrsqrt.f32 %v3146_v59  ;;  %v3452_v59 = vld [vmem:[%s5780_s17 + $0x20] sm:$0xff] }
0x11c4   :  { %v4712_v34 = vpop.eup %4711 }
0x11c5   :  { %v3149_v53 = vmul.f32 %v4712_v34, %v5524_v21  ;;  %v3821_v21 = vld [vmem:[%s5776_s13 + $0x160] sm:$0xff]  ;;  %v3453_v34 = vld [vmem:[%s5780_s17 + $0x28] sm:$0xff] }
0x11c6   :  { %v4515_v12 = vpack.c.bf16 %v3822_v47, %v3821_v21 }
0x11c7   :  { %v3157_v38 = vmul.f32 %v3788_v35, %v3149_v53  ;;  %v3454_v53 = vld [vmem:[%s5780_s17 + $0x30] sm:$0xff] }
0x11c8   :  { %v4714_v39 = vpop.eup %4713  ;;  %4516 = vmatpush3.bf16.msra.mxu1 %v4515_v12 }
0x11c9   :  { %v3165_v43 = vadd.f32 %v3789_v36, %v3157_v38  ;;  %v3150_v44 = vmul.f32 %v4714_v39, %v5522_v40  ;;  %v3839_v40 = vld [vmem:[%s5776_s13 + $0x1f0] sm:$0xff]  ;;  %v3546_v39 = vld [vmem:[%s5782_s19] sm:$0xff] }
0x11cb   :  { %3807 = vmatmul.mubr.msk.f32.vlgmr.msra.gmra.mrb[36].mxu0 %vm301_vm5, %v3165_v43  ;;  %v3158_v45 = vmul.f32 %v3788_v35, %v3150_v44  ;;  %v4529_v35 = vpack.c.bf16 %v3453_v34, %v3452_v59 }
0x11cc   :  { %3273 = vmatprep.mubr.f32.mxu0 %v4753_v42  ;;  %v3840_v42 = vld [vmem:[%s5776_s13 + $0x1f8] sm:$0xff]  ;;  %4524 = vmatpush3.bf16.msra.mxu0 %v4521_v28 }
0x11cd   :  { %v3166_v46 = vadd.f32 %v3789_v36, %v3158_v45  ;;  %v4517_v48 = vpack.c.bf16 %v3840_v42, %v3839_v40  ;;  %4526 = vmatprep.subr.bf16.mxu0 %v4525_v33  ;;  %v3455_v36 = vld [vmem:[%s5780_s17 + $0x38] sm:$0xff] }
0x11ce   :  { %v4533_v38 = vpack.c.bf16 %v3455_v36, %v3454_v53 }
0x11cf   :  { %3808 = vmatmul.mubr.msk.f32.gmra.mrb[38].mxu0 %vm301_vm5, %v3166_v46  ;;  %4518 = vmatprep.subr.bf16.mxu1 %v4517_v48  ;;  %v3845_v48 = vld [vmem:[%s5778_s15 + $0x3] ss:$0 sm:$0xff] }
0x11d0   :  { %4520 = vmatpush3.bf16.msra.mxu1 %v4519_v55  ;;  %4528 = vmatpush3.bf16.msra.mxu0 %v4525_v33 }
0x11d1   :  { %4530 = vmatprep.subr.bf16.mxu0 %v4529_v35 }
0x11d4   :  { %4532 = vmatpush3.bf16.msra.mxu0 %v4529_v35 }
0x11d5   :  { %4534 = vmatprep.subr.bf16.mxu0 %v4533_v38 }
0x11d8   :  { %4536 = vmatpush3.bf16.msra.mxu0 %v4533_v38 }
0x129e   :  { %v3269_v61 = vpop.f32.mrb[36].mxu0 }
0x129f   :  { %v3270_v62 = vadd.f32 %v3269_v61, %v3190_v58  ;;  %v3271_v63 = vpop.f32.mrb[37].mxu0 }
0x12a0   :  { %v3272_v0 = vadd.f32 %v3271_v63, %v3194_v60  ;;  %v3548_v63 = vld [vmem:[%s5782_s19 + $0x10] sm:$0xff] }
0x12a1   :  { %v3280_v3 = vmax.f32 %v3270_v62, 0.0 }
0x12a2   :  { %v3281_v1 = vmax.f32 %v3272_v0, 0.0  ;;  %v3275_v2 = vpop.f32.mrb[38].mxu0  ;;  %v3549_v0 = vld [vmem:[%s5782_s19 + $0x18] sm:$0xff] }
0x12a3   :  { %v3276_v5 = vadd.f32 %v3275_v2, %v3190_v58  ;;  %v3277_v4 = vpop.f32.mrb[39].mxu0  ;;  %v3847_v2 = vld [vmem:[%s5781_s18] ss:$0 sm:$0xff]  ;;  %s4761_s18 = smov [#allocation2]  }
0x12a4   :  { %v3278_v6 = vadd.f32 %v3277_v4, %v3194_v60  ;;  %3389 = vmatprep.mubr.f32.mxu1 %v3281_v1  ;;  %v4541_v1 = vpack.c.bf16 %v3549_v0, %v3548_v63 }
0x12a5   :  { %3390 = vmatmul.mubr.f32.vlgmr.msra.gmra.mrb[20].mxu1 %v3280_v3  ;;  %v3282_v8 = vmax.f32 %v3276_v5, 0.0 }
0x12a6   :  { %v3283_v7 = vmax.f32 %v3278_v6, 0.0 }
0x12a8   :  { %3394 = vmatprep.mubr.f32.mxu1 %v3283_v7 }
0x12a9   :  { %3395 = vmatmul.mubr.f32.gmra.mrb[22].mxu1 %v3282_v8 }
0x1378   :  { %v4029_v9 = vpop.f32.mrb[20].mxu1 }
0x1379   :  { %v4030_v57 = vpop.f32.mrb[21].mxu1 }
0x137a   :  { %v4031_v13 = vadd.f32 %v4030_v57, %v4029_v9  ;;  %v3850_v9 = vld [vmem:[%s5783_s20] ss:$0 sm:$0xff] }
0x137c   :  { %v3392_v51 = vadd.f32 %v4031_v13, %v3842_v54  ;;  %v4032_v11 = vpop.f32.mrb[22].mxu1 }
0x137d   :  { %v4033_v49 = vpop.f32.mrb[23].mxu1 }
0x137e   :  { %v4034_v14 = vadd.f32 %v4033_v49, %v4032_v11  ;;  %v3400_v15 = vadd.f32 %v3392_v51, %v3165_v43  ;;  %v3547_v43 = vld [vmem:[%s5782_s19 + $0x8] sm:$0xff]  ;;  %s3663_s19 = sshll.u32 %s4761_s18, 4  ;;  %s3664_s19 = int_to_ptr.vmem [resolvable:$true] %s3663_s19 }
0x137f   :  { %v4537_v44 = vpack.c.bf16 %v3547_v43, %v3546_v39  ;;  %s4728_s20 = scalar_lea.vmem %s3664_s19, 256  ;;  %p4733_p1 = scmp.lt.s32.totalorder %s3664_s19, %s3664_s19 }
0x1380   :  { %v3397_v16 = vadd.f32 %v4034_v14, %v3842_v54  ;;  %v3406_v29 = vsel %vm301_vm5, %v3400_v15, 0.0  ;;  %p4729_p0 = scmp.ne.s32.totalorder %s3664_s19, %s4728_s20  ;;  %p4734_p2 = scmp.lt.s32.totalorder %s4728_s20, %s4728_s20 }
0x1381   :  { %3407 = vadd.xlane.f32.xlu1 %v3406_v29  ;;  %4538 = vmatprep.subr.bf16.mxu0 %v4537_v44 }
0x1382   :  { %v3401_v17 = vadd.f32 %v3397_v16, %v3166_v46  ;;  %p4735_p3 = por %p4734_p2, %p4733_p1 }
0x1384   :  { %v3409_v18 = vsel %vm301_vm5, %v3401_v17, 0.0  ;;  %p4736_p4 = pnand %p4735_p3, %p4729_p0 }
0x1385   :  { %3410 = vadd.xlane.f32.xlu0 %v3409_v18 }
0x140e   :  { %v3408_v30 = vpop.xlane.xlu1 %3407 }
0x140f   :  { %v3412_v19 = vmul.f32 0.015625, %v3408_v30 }
0x1411   :  { %v3414_v37 = vsub.f32 %v3400_v15, %v3412_v19 }
0x1412   :  { %v3411_v22 = vpop.xlane.xlu0 %3410 }
0x1413   :  { %v3413_v23 = vmul.f32 0.015625, %v3411_v22  ;;  %v3416_v20 = vmul.f32 %v3414_v37, %v3414_v37 }
0x1415   :  { %v3415_v24 = vsub.f32 %v3401_v17, %v3413_v23  ;;  %v3418_v41 = vsel %vm301_vm5, %v3416_v20, 0.0 }
0x1416   :  { %3419 = vadd.xlane.f32.xlu1 %v3418_v41 }
0x1417   :  { %v3417_v25 = vmul.f32 %v3415_v24, %v3415_v24 }
0x1419   :  { %v3421_v26 = vsel %vm301_vm5, %v3417_v25, 0.0 }
0x141a   :  { %3422 = vadd.xlane.f32.xlu0 %v3421_v26 }
0x14a3   :  { %v3420_v45 = vpop.xlane.xlu1 %3419 }
0x14a4   :  { %v3424_v46 = vmul.f32 0.015625, %v3420_v45 }
0x14a6   :  { %v3426_v21 = vadd.f32 1e-05, %v3424_v46 }
0x14a7   :  { %v3423_v47 = vpop.xlane.xlu0 %3422 }
0x14a8   :  { %4715 = vrsqrt.f32 %v3426_v21  ;;  %v3425_v12 = vmul.f32 0.015625, %v3423_v47 }
0x14aa   :  { %v3427_v40 = vadd.f32 1e-05, %v3425_v12 }
0x14ac   :  { %4717 = vrsqrt.f32 %v3427_v40 }
0x14b2   :  { %v4716_v42 = vpop.eup %4715 }
0x14b3   :  { %v3430_v52 = vmul.f32 %v4716_v42, %v3414_v37 }
0x14b5   :  { %v3438_v55 = vmul.f32 %v3845_v48, %v3430_v52 }
0x14b6   :  { %v4718_v56 = vpop.eup %4717 }
0x14b7   :  { %v3431_v58 = vmul.f32 %v4718_v56, %v3415_v24  ;;  %v3446_v60 = vadd.f32 %v3846_v10, %v3438_v55 }
0x14b9   :  { %v3439_v61 = vmul.f32 %v3845_v48, %v3431_v58  ;;  %4253 = vmatprep.mubr.msk.f32.mxu0 %vm301_vm5, %v3446_v60 }
0x14bb   :  { %v3447_v62 = vadd.f32 %v3846_v10, %v3439_v61 }
0x14bd   :  { %4254 = vmatmul.mubr.msk.f32.vlgmr.msra.gmra.mrb[40].mxu0 %vm301_vm5, %v3447_v62 }
0x14be   :  { %4540 = vmatpush3.bf16.msra.mxu0 %v4537_v44 }
0x14bf   :  { %4542 = vmatprep.subr.bf16.mxu0 %v4541_v1 }
0x14c2   :  { %4544 = vmatpush3.bf16.msra.mxu0 %v4541_v1 }
0x1590   :  { %v4255_v3 = vpop.f32.mrb[40].mxu0 }
0x1591   :  { %v3541_v5 = vadd.f32 %v4255_v3, %v3847_v2  ;;  %v3535_v4 = vpop.f32.mrb[41].mxu0 }
0x1592   :  { %v3536_v6 = vadd.f32 %v3847_v2, %v3535_v4 }
0x1593   :  { %v3545_v8 = vmax.f32 %v3541_v5, 0.0 }
0x1594   :  { %v3544_v7 = vmax.f32 %v3536_v6, 0.0 }
0x1596   :  { %4264 = vmatprep.mubr.msk.f32.mxu0 %vm179_vm4, %v3544_v7 }
0x1597   :  { %4265 = vmatmul.mubr.msk.f32.vlgmr.msra.gmra.mrb[42].mxu0 %vm179_vm4, %v3545_v8 }
0x166a   :  { %v4266_v54 = vpop.f32.mrb[42].mxu0 }
0x166b   :  { %v3635_v57 = vadd.f32 %v4266_v54, %v3850_v9  ;;  %v3629_v13 = vpop.f32.mrb[43].mxu0 }
0x166c   :  { %v3630_v51 = vadd.f32 %v3850_v9, %v3629_v13 }
0x166d   :  { %3640 = vmax.xlane.f32.xlu0 %v3635_v57 }
0x166e   :  { %3638 = vmax.xlane.f32.xlu1 %v3630_v51 }
0x16fa   :  { %v3641_v11 = vpop.xlane.xlu0 %3640 }
0x16fb   :  { %v3643_v49 = vsub.f32 %v3635_v57, %v3641_v11  ;;  %v3639_v14 = vpop.xlane.xlu1 %3638 }
0x16fc   :  { %v3642_v15 = vsub.f32 %v3630_v51, %v3639_v14 }
0x16fd   :  { %v3646_v16 = vmul.f32 1.442695, %v3643_v49 }
0x16fe   :  { %v3644_v29 = vmul.f32 1.442695, %v3642_v15 }
0x16ff   :  { %4719 = vpow2.f32 %v3646_v16 }
0x1700   :  { %4721 = vpow2.f32 %v3644_v29 }
0x1709   :  { %v4720_v17 = vpop.eup %4719 }
0x170a   :  { %v4722_v18 = vpop.eup %4721  ;;  %3650 = vadd.xlane.f32.xlu0 %v4720_v17 }
0x170b   :  { %3648 = vadd.xlane.f32.xlu1 %v4722_v18 }
0x1797   :  { %v3651_v30 = vpop.xlane.xlu0 %3650 }
0x1798   :  { %4723 = vrcp.f32 %v3651_v30  ;;  %v3649_v19 = vpop.xlane.xlu1 %3648 }
0x1799   :  { %4725 = vrcp.f32 %v3649_v19 }
0x17a2   :  { %v4724_v37 = vpop.eup %4723 }
0x17a3   :  { %v4726_v22 = vpop.eup %4725  ;;  %v3655_v23 = vmul.f32 %v4724_v37, %v4720_v17 }
0x17a4   :  { %v3654_v20 = vmul.f32 %v4726_v22, %v4722_v18 }
0x17a5   :  { %3657 = vst [vmem:[#allocation2 + $0x8] sm:$0xff] %v3655_v23 }
0x17a6   :  { %3656 = vst [vmem:[#allocation2] sm:$0xff] %v3654_v20 }
0x17a7   :  { %4739 = shalt.err (!%p4736_p4)
}
0x17a8   :  { %s4740_s23 = scalar_lea.hbm %s5784_s21, 256 }
0x17a9   :  { %p4741_p5 = scmp.ne.s32.totalorder %s5784_s21, %s4740_s23  ;;  %p4744_p6 = scmp.lt.u32.totalorder %s4740_s23, %s5784_s21 }
0x17ab   :  { %p4746_p7 = pnand %p4744_p6, %p4741_p5 }
0x17ad   :  { %4749 = shalt.err (!%p4746_p7)
}
0x17ae   :  { %s4762_s22 = smov 128   ;;  %s4763_s29 = smov 8  }
0x17af   :  { %3669 = dma.vmem_to_hbm [thread:$0]  %s3664_s19, 256, %s5784_s21, [#allocation3], %s4762_s22, %s4762_s22, %s4763_s29  }
0x17b0   :  { %4750 = dma.done.wait [#allocation3], 256  }
0x17b1   :  { %4751 = vsyncadd [#allocation3], 4294967040 }
0x17b2   :  { %3673 = vsyncpa [#allocation3], 1 }

</bundles_post_ra>
